<compile_context>
chip_gen: v6e
topology: v6e:2x2x1
jax: 0.10.0
libtpu: 0.0.40
codegen_flags: <defaults>
</compile_context>

<pallas_src>
import functools
import math

import jax
import jax.numpy as jnp
from jax.experimental import pallas as pl
from jax.experimental.pallas import tpu as pltpu

LN_EPS = 1e-5  # PyTorch nn.LayerNorm default

# rows of the packed (10, Dq) parameter slab
(_LNQ_G, _LNQ_B, _B_Q, _B_K, _B_V, _B_O, _MLN_G, _MLN_B, _B_1, _B_2) = range(10)
# rows of the stacked (4, Dq, Dq) weight slab
(_W_Q, _W_O, _W_1, _W_2) = range(4)


def _layernorm_f32(x, g, b):
    x = x.astype(jnp.float32)
    mu = jnp.mean(x, axis=-1, keepdims=True)
    var = jnp.mean(jnp.square(x - mu), axis=-1, keepdims=True)
    return (x - mu) * jax.lax.rsqrt(var + LN_EPS) * g + b


def _erf(x):
    # Abramowitz & Stegun 7.1.26 polynomial erf, |abs err| < 1.5e-7 (f32-exact for GELU).
    a1, a2, a3, a4, a5 = 0.254829592, -0.284496736, 1.421413741, -1.453152027, 1.061405429
    p = 0.3275911
    s = jnp.where(x >= 0.0, 1.0, -1.0)
    ax = jnp.abs(x)
    t = pl.reciprocal(1.0 + p * ax, approx=True)   # EUP vrcp fast path
    poly = ((((a5 * t + a4) * t + a3) * t + a2) * t + a1) * t
    return s * (1.0 - poly * jnp.exp(-ax * ax))


def _gelu_exact(x):
    return 0.5 * x * (1.0 + _erf(x * (1.0 / math.sqrt(2.0))))


def _blk_iota(shape, dim, block):
    # value = (index along `dim`) // block, built from comparisons (no vector integer division).
    idx = jax.lax.broadcasted_iota(jnp.int32, shape, dim)
    out = jnp.zeros(shape, jnp.int32)
    t = block
    while t < shape[dim]:
        out = out + (idx >= t).astype(jnp.int32)
        t += block
    return out


def _cross_attn_kernel(*refs, num_heads, has_mask, need_weights):
    f32 = jnp.float32

    if has_mask:
        q_ref, kv_ref, mask_ref, vq_ref, vkv_ref, wqq_ref, wkv_ref = refs[:7]
        out_refs = refs[7:]
    else:
        q_ref, kv_ref, vq_ref, vkv_ref, wqq_ref, wkv_ref = refs[:6]
        mask_ref = None
        out_refs = refs[6:]
    out_ref = out_refs[0]
    attn_ref = out_refs[1] if need_weights else None

    bb, Lq, Dq = q_ref.shape
    _, Lk, Dkv = kv_ref.shape
    H = num_heads
    hd = Dq // H
    HLk = H * Lk
    scale = 1.0 / math.sqrt(hd)
    cdt = wqq_ref.dtype                      # bf16 MXU operand dtype

    vq = vq_ref[...].astype(f32)             # (10, Dq)  packed 1-D params
    vkv = vkv_ref[...].astype(f32)           # (2, Dkv)

    # ---- batch-folded LayerNorms -----------------------------------------------------------
    q2 = q_ref[...].reshape(bb * Lq, Dq)
    kv2 = kv_ref[...].reshape(bb * Lk, Dkv)
    norm_q = _layernorm_f32(q2, vq[_LNQ_G:_LNQ_G + 1], vq[_LNQ_B:_LNQ_B + 1]).astype(cdt)
    norm_kv = _layernorm_f32(kv2, vkv[0:1], vkv[1:2]).astype(cdt)

    # ---- projections (bf16 operands, f32 accumulation); 1/sqrt(hd) folded into Q once -------
    qp = (jnp.dot(norm_q, wqq_ref[_W_Q], preferred_element_type=f32)
          + vq[_B_Q:_B_Q + 1]) * scale                                     # (bb*Lq, Dq)
    kp = jnp.dot(norm_kv, wkv_ref[0], preferred_element_type=f32) + vq[_B_K:_B_K + 1]
    vp = jnp.dot(norm_kv, wkv_ref[1], preferred_element_type=f32) + vq[_B_V:_B_V + 1]

    # ---- head-batched attention via block-diagonal (head-masked) K/V slabs ------------------
    # kexp[b, h*Lk+k, D] = K[b, k, D] * [D belongs to head h]  (same mask for V), so a single
    # 'bqd,bkd->bqk' einsum yields all heads' scores and 'bqk,bkd->bqd' the full context.
    rh = _blk_iota((HLk, Dq), 0, Lk)         # row's head index
    ch = _blk_iota((HLk, Dq), 1, hd)         # column's head index
    headmask = (rh == ch).astype(f32)        # (HLk, Dq) static block-diagonal mask

    kp3 = kp.reshape(bb, Lk, Dq)
    vp3 = vp.reshape(bb, Lk, Dq)
    kexp = (jnp.concatenate([kp3] * H, axis=1) * headmask).astype(cdt)     # (bb, HLk, Dq)
    vexp = (jnp.concatenate([vp3] * H, axis=1) * headmask).astype(cdt)

    qp3 = qp.reshape(bb, Lq, Dq).astype(cdt)
    s3 = jnp.einsum("bqd,bkd->bqk", qp3, kexp, preferred_element_type=f32)  # (bb, Lq, HLk)
    if has_mask:
        # -1e30 (not -inf): a fully-masked row gives uniform weights instead of PyTorch's NaNs.
        bias = jnp.where(mask_ref[...] != 0, f32(-1e30), f32(0.0))          # (bb, 1, Lk)
        s3 = s3 + jnp.concatenate([bias] * H, axis=-1)                      # broadcast over Lq

    # per-(b, q, head) softmax on the 2-D slab; the per-row max is constant within every
    # head segment, so subtracting it keeps each head's softmax exact.
    s2 = s3.reshape(bb * Lq, HLk)
    s2 = s2 - jnp.max(s2, axis=-1, keepdims=True)
    e2 = jnp.exp(s2)
    seg_r = _blk_iota((HLk, HLk), 0, Lk)
    seg_c = _blk_iota((HLk, HLk), 1, Lk)
    seg = (seg_r == seg_c).astype(f32)                                      # segment-sum matrix
    denom = jnp.dot(e2, seg, preferred_element_type=f32)   # per-head sums, broadcast to lanes
    denom = jnp.maximum(denom, 1e-30)
    p2 = e2 * pl.reciprocal(denom, approx=True)                             # (bb*Lq, HLk)

    if need_weights:
        # PyTorch MultiheadAttention default: weights averaged over heads -> one tiny matmul.
        jh = _blk_iota((HLk, Lk), 0, Lk)
        ji = jax.lax.broadcasted_iota(jnp.int32, (HLk, Lk), 0)
        jk = ji - Lk * jh                                                   # j % Lk, div-free
        ck = jax.lax.broadcasted_iota(jnp.int32, (HLk, Lk), 1)
        avg = jnp.where(jk == ck, f32(1.0 / H), f32(0.0))
        attn2 = jnp.dot(p2, avg, preferred_element_type=f32)                # (bb*Lq, Lk)
        attn3 = attn2.reshape(bb, Lq, Lk).astype(attn_ref.dtype)
        for qi in range(Lq):                      # fill the lane-dense (bb, 1, Lq*Lk) block
            attn_ref[:, :, qi * Lk:(qi + 1) * Lk] = attn3[:, qi:qi + 1, :]

    p3 = p2.reshape(bb, Lq, HLk).astype(cdt)
    ctx = jnp.einsum("bqk,bkd->bqd", p3, vexp, preferred_element_type=f32)  # (bb, Lq, Dq)
    ctx2 = ctx.reshape(bb * Lq, Dq).astype(cdt)

    # ---- output projection + residual (residual re-read here: shorter live range) -----------
    resid = q_ref[...].reshape(bb * Lq, Dq).astype(f32)
    latent = (jnp.dot(ctx2, wqq_ref[_W_O], preferred_element_type=f32)
              + vq[_B_O:_B_O + 1] + resid)

    # ---- MLP(query_dim -> query_dim): pre-LN -> Linear -> exact GELU -> Linear, + residual ---
    h = _layernorm_f32(latent, vq[_MLN_G:_MLN_G + 1], vq[_MLN_B:_MLN_B + 1]).astype(cdt)
    h = jnp.dot(h, wqq_ref[_W_1], preferred_element_type=f32) + vq[_B_1:_B_1 + 1]
    h = _gelu_exact(h).astype(cdt)
    h = jnp.dot(h, wqq_ref[_W_2], preferred_element_type=f32) + vq[_B_2:_B_2 + 1]
    latent = latent + h

    lat3 = latent.reshape(bb, Lq, Dq).astype(out_ref.dtype)
    for qi in range(Lq):                          # fill the lane-dense (bb, 1, Lq*Dq) block
        out_ref[:, :, qi * Dq:(qi + 1) * Dq] = lat3[:, qi:qi + 1, :]


def _vmem_bytes_estimate(bb, Lq, Lk, Dq, Dkv, H):
    f32, bf16 = 4, 2
    HLk = H * Lk
    io = 2 * bb * (Lq * Dq + Lk * Dkv + Lk + Lq * Dq + Lq * Lk) * f32   # double-buffered blocks
    weights = (4 * Dq * Dq + 2 * Dkv * Dq) * bf16 + (10 * Dq + 2 * Dkv) * f32
    inter = bb * (8 * Lq * Dq + 6 * Lk * Dq + 2 * Lk * Dkv + 6 * Lq * HLk) * f32
    consts = (HLk * Dq + HLk * HLk + HLk * Lk) * f32
    return io + weights + inter + consts


def _pick_block_b(B, Lq, Lk, Dq, Dkv, H, target_rows=512, vmem_budget=40 << 20):
    # aim for >= target_rows folded matmul rows per step, keep >= 2 grid steps (v7x: 2 TCs),
    # and stay inside a v7x-derived (64 MiB physical) VMEM budget.
    bb = max(1, min(B, max(1, target_rows // max(Lq, 1))))
    if B >= 2:
        bb = min(bb, B // 2)
    while bb > 1 and _vmem_bytes_estimate(bb, Lq, Lk, Dq, Dkv, H) > vmem_budget:
        bb -= 1
    while B % bb:
        bb -= 1
    return max(bb, 1)


def cross_attn_forward(params, query, key_val, key_padding_mask=None,
                       need_weights=True, block_b=None, compute_dtype=jnp.bfloat16):
    B, Lq, Dq = query.shape
    _, Lk, Dkv = key_val.shape
    H = int(params["num_heads"])
    assert Dq % H == 0

    if block_b is None:
        block_b = _pick_block_b(B, Lq, Lk, Dq, Dkv, H)
    assert B % block_b == 0
    has_mask = key_padding_mask is not None

    # Pack the 14 tiny 1-D params into two slabs and the 6 weight matrices into two stacks
    # (4 replicated parameter DMAs instead of 16); weights cast once to the bf16 operand dtype.
    vec_q = jnp.stack([params[k] for k in
                       ("ln_q_g", "ln_q_b", "bq", "bk", "bv", "bo",
                        "mlp_ln_g", "mlp_ln_b", "b1", "b2")]).astype(jnp.float32)   # (10, Dq)
    vec_kv = jnp.stack([params["ln_kv_g"], params["ln_kv_b"]]).astype(jnp.float32)  # (2, Dkv)
    w_qq = jnp.stack([params["wq"], params["wo"],
                      params["w1"], params["w2"]]).astype(compute_dtype)            # (4, Dq, Dq)
    w_kv = jnp.stack([params["wk"], params["wv"]]).astype(compute_dtype)            # (2, Dkv, Dq)

    def _rep(shape):
        n = len(shape)
        return pl.BlockSpec(shape, lambda b, n=n: (0,) * n)

    in_specs = [
        pl.BlockSpec((block_b, Lq, Dq), lambda b: (b, 0, 0)),
        pl.BlockSpec((block_b, Lk, Dkv), lambda b: (b, 0, 0)),
    ]
    operands = [query, key_val]
    if has_mask:
        in_specs.append(pl.BlockSpec((block_b, 1, Lk), lambda b: (b, 0, 0)))
        operands.append(key_padding_mask.astype(jnp.int32).reshape(B, 1, Lk))
    in_specs += [_rep(vec_q.shape), _rep(vec_kv.shape), _rep(w_qq.shape), _rep(w_kv.shape)]
    operands += [vec_q, vec_kv, w_qq, w_kv]

    # Lane-dense outputs (last dim Lq*Dq / Lq*Lk); wrapper reshapes back to (B, Lq, D).
    out_shape = [jax.ShapeDtypeStruct((B, 1, Lq * Dq), query.dtype)]
    out_specs = [pl.BlockSpec((block_b, 1, Lq * Dq), lambda b: (b, 0, 0))]
    if need_weights:
        out_shape.append(jax.ShapeDtypeStruct((B, 1, Lq * Lk), jnp.float32))
        out_specs.append(pl.BlockSpec((block_b, 1, Lq * Lk), lambda b: (b, 0, 0)))

    est = _vmem_bytes_estimate(block_b, Lq, Lk, Dq, Dkv, H)
    vmem_limit = int(min(max(2 * est, 32 << 20), 56 << 20))   # >= defaults, <= v7x-safe

    kernel = functools.partial(_cross_attn_kernel, num_heads=H,
                               has_mask=has_mask, need_weights=need_weights)

    outs = pl.pallas_call(
        kernel,
        out_shape=tuple(out_shape),
        grid=(B // block_b,),
        in_specs=in_specs,
        out_specs=tuple(out_specs),
        compiler_params=pltpu.CompilerParams(
            dimension_semantics=("parallel",),
            vmem_limit_bytes=vmem_limit),
    )(*operands)

    latent = outs[0].reshape(B, Lq, Dq)
    if need_weights:
        attn = outs[1].reshape(B, Lq, Lk)
        return latent, attn
    return latent, None


def init_params(key, query_dim, key_val_dim, num_heads):
    ks = jax.random.split(key, 12)

    def lin_w(k, din, dout):
        s = 1.0 / math.sqrt(din)
        return jax.random.uniform(k, (din, dout), jnp.float32, -s, s)   # PyTorch W.T layout

    def lin_b(k, d):
        return 0.02 * jax.random.normal(k, (d,), jnp.float32)

    return dict(
        num_heads=num_heads,
        ln_kv_g=jnp.ones((key_val_dim,), jnp.float32),
        ln_kv_b=jnp.zeros((key_val_dim,), jnp.float32),
        ln_q_g=jnp.ones((query_dim,), jnp.float32),
        ln_q_b=jnp.zeros((query_dim,), jnp.float32),
        wq=lin_w(ks[0], query_dim, query_dim), bq=lin_b(ks[1], query_dim),
        wk=lin_w(ks[2], key_val_dim, query_dim), bk=lin_b(ks[3], query_dim),
        wv=lin_w(ks[4], key_val_dim, query_dim), bv=lin_b(ks[5], query_dim),
        wo=lin_w(ks[6], query_dim, query_dim), bo=lin_b(ks[7], query_dim),
        mlp_ln_g=jnp.ones((query_dim,), jnp.float32),
        mlp_ln_b=jnp.zeros((query_dim,), jnp.float32),
        w1=lin_w(ks[8], query_dim, query_dim), b1=lin_b(ks[9], query_dim),
        w2=lin_w(ks[10], query_dim, query_dim), b2=lin_b(ks[11], query_dim),
    )


def cross_attn_reference(params, query, key_val, key_padding_mask=None):
    # Pure-JAX f32 mirror of the PyTorch forward (sanity check).
    def ln(x, g, b):
        mu = jnp.mean(x, axis=-1, keepdims=True)
        var = jnp.mean((x - mu) ** 2, axis=-1, keepdims=True)
        return (x - mu) / jnp.sqrt(var + LN_EPS) * g + b

    with jax.default_matmul_precision("highest"):
        B, Lq, Dq = query.shape
        _, Lk, _ = key_val.shape
        H = int(params["num_heads"]); hd = Dq // H
        nq = ln(query, params["ln_q_g"], params["ln_q_b"])
        nkv = ln(key_val, params["ln_kv_g"], params["ln_kv_b"])
        qp = nq @ params["wq"] + params["bq"]
        kp = nkv @ params["wk"] + params["bk"]
        vp = nkv @ params["wv"] + params["bv"]
        qh = qp.reshape(B, Lq, H, hd).transpose(0, 2, 1, 3)
        kh = kp.reshape(B, Lk, H, hd).transpose(0, 2, 1, 3)
        vh = vp.reshape(B, Lk, H, hd).transpose(0, 2, 1, 3)
        scores = jnp.einsum("bhqd,bhkd->bhqk", qh, kh) / math.sqrt(hd)
        if key_padding_mask is not None:
            scores = scores + jnp.where(key_padding_mask, -1e30, 0.0)[:, None, None, :]
        p = jax.nn.softmax(scores, axis=-1)
        ctx = jnp.einsum("bhqk,bhkd->bhqd", p, vh).transpose(0, 2, 1, 3).reshape(B, Lq, Dq)
        latent = ctx @ params["wo"] + params["bo"] + query
        h = ln(latent, params["mlp_ln_g"], params["mlp_ln_b"])
        h = h @ params["w1"] + params["b1"]
        h = jax.nn.gelu(h, approximate=False)
        h = h @ params["w2"] + params["b2"]
        latent = h + latent
        return latent, p.mean(axis=1)


if __name__ == "__main__":
    B, Lq, Lk = 2, 8, 16
    Dq, Dkv, H = 32, 48, 4
    TOL = dict(atol=3e-2, rtol=3e-2)   # bf16 MXU operands vs f32 reference

    root = jax.random.PRNGKey(0)
    k_params, k_q, k_kv = jax.random.split(root, 3)
    params = init_params(k_params, Dq, Dkv, H)
    query = jax.random.normal(k_q, (B, Lq, Dq), jnp.float32)
    key_val = jax.random.normal(k_kv, (B, Lk, Dkv), jnp.float32)

    # 1) unmasked path, with head-averaged attention weights (module's return signature).
    latent, weights = cross_attn_forward(params, query, key_val, key_padding_mask=None)
    jax.block_until_ready((latent, weights))
    ref_latent, ref_weights = cross_attn_reference(params, query, key_val, None)
    assert latent.shape == (B, Lq, Dq) and weights.shape == (B, Lq, Lk)
    assert jnp.allclose(latent, ref_latent, **TOL), "latent mismatch"
    assert jnp.allclose(weights, ref_weights, **TOL), "attn weights mismatch"

    # 2) key_padding_mask path (mask expanded to an additive bias inside the kernel).
    lens = jnp.array([Lk, Lk - 5])
    kpm = jnp.arange(Lk)[None, :] >= lens[:, None]          # bool (B, Lk), True = padded key
    latent_m, weights_m = cross_attn_forward(params, query, key_val, key_padding_mask=kpm)
    jax.block_until_ready((latent_m, weights_m))
    ref_latent_m, ref_weights_m = cross_attn_reference(params, query, key_val, kpm)
    assert jnp.allclose(latent_m, ref_latent_m, **TOL), "masked latent mismatch"
    assert jnp.allclose(weights_m, ref_weights_m, **TOL), "masked attn mismatch"

    # 3) weights not consumed downstream: drop the attention-weights output entirely.
    latent_nw, none_w = cross_attn_forward(params, query, key_val, need_weights=False)
    jax.block_until_ready(latent_nw)
    assert none_w is None
    assert jnp.allclose(latent_nw, ref_latent, **TOL), "no-weights latent mismatch"

    print("KERNEL_OK")
</pallas_src>

<mosaic_0001>
module attributes {stable_mosaic.version = 11 : i64} {
  func.func @_cross_attn_kernel(%arg0: i32, %arg1: memref<1x8x32xf32, #tpu.memory_space<vmem>>, %arg2: memref<1x16x48xf32, #tpu.memory_space<vmem>>, %arg3: memref<10x32xf32, #tpu.memory_space<vmem>>, %arg4: memref<2x48xf32, #tpu.memory_space<vmem>>, %arg5: memref<4x32x32xbf16, #tpu.memory_space<vmem>>, %arg6: memref<2x48x32xbf16, #tpu.memory_space<vmem>>, %arg7: memref<1x1x256xf32, #tpu.memory_space<vmem>>, %arg8: memref<1x1x128xf32, #tpu.memory_space<vmem>>) attributes {dimension_semantics = [#tpu.dimension_semantics<parallel>], iteration_bounds = array<i64: 2>, scalar_prefetch = 0 : i64, scratch_operands = 0 : i64, tpu.core_type = #tpu.core_type<tc>, window_params = [{transform_indices = @transform_0, window_bounds = array<i64: 1, 8, 32>}, {transform_indices = @transform_1, window_bounds = array<i64: 1, 16, 48>}, {pipeline_mode = #tpu.pipeline_mode<synchronous>, transform_indices = @transform_2, window_bounds = array<i64: 10, 32>}, {pipeline_mode = #tpu.pipeline_mode<synchronous>, transform_indices = @transform_3, window_bounds = array<i64: 2, 48>}, {pipeline_mode = #tpu.pipeline_mode<synchronous>, transform_indices = @transform_4, window_bounds = array<i64: 4, 32, 32>}, {pipeline_mode = #tpu.pipeline_mode<synchronous>, transform_indices = @transform_5, window_bounds = array<i64: 2, 48, 32>}, {transform_indices = @transform_6, window_bounds = array<i64: 1, 1, 256>}, {transform_indices = @transform_7, window_bounds = array<i64: 1, 1, 128>}]} {
    %c0 = arith.constant 0 : index
    %c0_0 = arith.constant 0 : index
    %0 = vector.load %arg3[%c0, %c0_0] : memref<10x32xf32, #tpu.memory_space<vmem>>, vector<10x32xf32>
    %c0_1 = arith.constant 0 : index
    %c0_2 = arith.constant 0 : index
    %1 = vector.load %arg4[%c0_1, %c0_2] : memref<2x48xf32, #tpu.memory_space<vmem>>, vector<2x48xf32>
    %c0_3 = arith.constant 0 : index
    %c0_4 = arith.constant 0 : index
    %c0_5 = arith.constant 0 : index
    %2 = vector.load %arg1[%c0_3, %c0_4, %c0_5] : memref<1x8x32xf32, #tpu.memory_space<vmem>>, vector<1x8x32xf32>
    %3 = vector.shape_cast %2 : vector<1x8x32xf32> to vector<8x32xf32>
    %c0_6 = arith.constant 0 : index
    %c0_7 = arith.constant 0 : index
    %c0_8 = arith.constant 0 : index
    %4 = vector.load %arg2[%c0_6, %c0_7, %c0_8] : memref<1x16x48xf32, #tpu.memory_space<vmem>>, vector<1x16x48xf32>
    %5 = vector.shape_cast %4 : vector<1x16x48xf32> to vector<16x48xf32>
    %6 = vector.extract_strided_slice %0 {offsets = [0, 0], sizes = [1, 32], strides = [1, 1]} : vector<10x32xf32> to vector<1x32xf32>
    %7 = vector.extract_strided_slice %0 {offsets = [1, 0], sizes = [1, 32], strides = [1, 1]} : vector<10x32xf32> to vector<1x32xf32>
    %cst = arith.constant dense<0.000000e+00> : vector<8xf32>
    %8 = vector.multi_reduction <add>, %3, %cst [1] : vector<8x32xf32> to vector<8xf32>
    %9 = vector.shape_cast %8 : vector<8xf32> to vector<8x1xf32>
    %cst_9 = arith.constant 3.200000e+01 : f32
    %10 = vector.broadcast %cst_9 : f32 to vector<8x1xf32>
    %11 = arith.divf %9, %10 : vector<8x1xf32>
    %12 = vector.broadcast %11 : vector<8x1xf32> to vector<8x32xf32>
    %13 = arith.subf %3, %12 : vector<8x32xf32>
    %14 = arith.mulf %13, %13 : vector<8x32xf32>
    %cst_10 = arith.constant dense<0.000000e+00> : vector<8xf32>
    %15 = vector.multi_reduction <add>, %14, %cst_10 [1] : vector<8x32xf32> to vector<8xf32>
    %16 = vector.shape_cast %15 : vector<8xf32> to vector<8x1xf32>
    %cst_11 = arith.constant 3.200000e+01 : f32
    %17 = vector.broadcast %cst_11 : f32 to vector<8x1xf32>
    %18 = arith.divf %16, %17 : vector<8x1xf32>
    %19 = vector.broadcast %11 : vector<8x1xf32> to vector<8x32xf32>
    %20 = arith.subf %3, %19 : vector<8x32xf32>
    %cst_12 = arith.constant 9.99999974E-6 : f32
    %21 = vector.broadcast %cst_12 : f32 to vector<8x1xf32>
    %22 = arith.addf %18, %21 : vector<8x1xf32>
    %23 = math.rsqrt %22 : vector<8x1xf32>
    %24 = vector.broadcast %23 : vector<8x1xf32> to vector<8x32xf32>
    %25 = arith.mulf %20, %24 : vector<8x32xf32>
    %26 = vector.broadcast %6 : vector<1x32xf32> to vector<8x32xf32>
    %27 = arith.mulf %25, %26 : vector<8x32xf32>
    %28 = vector.broadcast %7 : vector<1x32xf32> to vector<8x32xf32>
    %29 = arith.addf %27, %28 : vector<8x32xf32>
    %30 = arith.truncf %29 : vector<8x32xf32> to vector<8x32xbf16>
    %31 = vector.extract_strided_slice %1 {offsets = [0, 0], sizes = [1, 48], strides = [1, 1]} : vector<2x48xf32> to vector<1x48xf32>
    %32 = vector.extract_strided_slice %1 {offsets = [1, 0], sizes = [1, 48], strides = [1, 1]} : vector<2x48xf32> to vector<1x48xf32>
    %cst_13 = arith.constant dense<0.000000e+00> : vector<16xf32>
    %33 = vector.multi_reduction <add>, %5, %cst_13 [1] : vector<16x48xf32> to vector<16xf32>
    %34 = vector.shape_cast %33 : vector<16xf32> to vector<16x1xf32>
    %cst_14 = arith.constant 4.800000e+01 : f32
    %35 = vector.broadcast %cst_14 : f32 to vector<16x1xf32>
    %36 = arith.divf %34, %35 : vector<16x1xf32>
    %37 = vector.broadcast %36 : vector<16x1xf32> to vector<16x48xf32>
    %38 = arith.subf %5, %37 : vector<16x48xf32>
    %39 = arith.mulf %38, %38 : vector<16x48xf32>
    %cst_15 = arith.constant dense<0.000000e+00> : vector<16xf32>
    %40 = vector.multi_reduction <add>, %39, %cst_15 [1] : vector<16x48xf32> to vector<16xf32>
    %41 = vector.shape_cast %40 : vector<16xf32> to vector<16x1xf32>
    %cst_16 = arith.constant 4.800000e+01 : f32
    %42 = vector.broadcast %cst_16 : f32 to vector<16x1xf32>
    %43 = arith.divf %41, %42 : vector<16x1xf32>
    %44 = vector.broadcast %36 : vector<16x1xf32> to vector<16x48xf32>
    %45 = arith.subf %5, %44 : vector<16x48xf32>
    %cst_17 = arith.constant 9.99999974E-6 : f32
    %46 = vector.broadcast %cst_17 : f32 to vector<16x1xf32>
    %47 = arith.addf %43, %46 : vector<16x1xf32>
    %48 = math.rsqrt %47 : vector<16x1xf32>
    %49 = vector.broadcast %48 : vector<16x1xf32> to vector<16x48xf32>
    %50 = arith.mulf %45, %49 : vector<16x48xf32>
    %51 = vector.broadcast %31 : vector<1x48xf32> to vector<16x48xf32>
    %52 = arith.mulf %50, %51 : vector<16x48xf32>
    %53 = vector.broadcast %32 : vector<1x48xf32> to vector<16x48xf32>
    %54 = arith.addf %52, %53 : vector<16x48xf32>
    %55 = arith.truncf %54 : vector<16x48xf32> to vector<16x48xbf16>
    %c0_18 = arith.constant 0 : index
    %c0_19 = arith.constant 0 : index
    %c0_20 = arith.constant 0 : index
    %56 = vector.load %arg5[%c0_18, %c0_19, %c0_20] : memref<4x32x32xbf16, #tpu.memory_space<vmem>>, vector<1x32x32xbf16>
    %57 = vector.shape_cast %56 : vector<1x32x32xbf16> to vector<32x32xbf16>
    %cst_21 = arith.constant dense<0.000000e+00> : vector<8x32xf32>
    %58 = tpu.matmul %30, %57, %cst_21 {dimension_numbers = #tpu.dot_dimension_numbers<[1], [0], [0], [1], [0, 0, 1, 1], [], []>} : vector<8x32xbf16>, vector<32x32xbf16>, vector<8x32xf32> -> vector<8x32xf32>
    %59 = vector.extract_strided_slice %0 {offsets = [2, 0], sizes = [1, 32], strides = [1, 1]} : vector<10x32xf32> to vector<1x32xf32>
    %60 = vector.broadcast %59 : vector<1x32xf32> to vector<8x32xf32>
    %61 = arith.addf %58, %60 : vector<8x32xf32>
    %cst_22 = arith.constant 0.353553385 : f32
    %62 = vector.broadcast %cst_22 : f32 to vector<8x32xf32>
    %63 = arith.mulf %61, %62 : vector<8x32xf32>
    %c0_23 = arith.constant 0 : index
    %c0_24 = arith.constant 0 : index
    %c0_25 = arith.constant 0 : index
    %64 = vector.load %arg6[%c0_23, %c0_24, %c0_25] : memref<2x48x32xbf16, #tpu.memory_space<vmem>>, vector<1x48x32xbf16>
    %65 = vector.shape_cast %64 : vector<1x48x32xbf16> to vector<48x32xbf16>
    %cst_26 = arith.constant dense<0.000000e+00> : vector<16x32xf32>
    %66 = tpu.matmul %55, %65, %cst_26 {dimension_numbers = #tpu.dot_dimension_numbers<[1], [0], [0], [1], [0, 0, 1, 1], [], []>} : vector<16x48xbf16>, vector<48x32xbf16>, vector<16x32xf32> -> vector<16x32xf32>
    %67 = vector.extract_strided_slice %0 {offsets = [3, 0], sizes = [1, 32], strides = [1, 1]} : vector<10x32xf32> to vector<1x32xf32>
    %68 = vector.broadcast %67 : vector<1x32xf32> to vector<16x32xf32>
    %69 = arith.addf %66, %68 : vector<16x32xf32>
    %c1 = arith.constant 1 : index
    %c0_27 = arith.constant 0 : index
    %c0_28 = arith.constant 0 : index
    %70 = vector.load %arg6[%c1, %c0_27, %c0_28] : memref<2x48x32xbf16, #tpu.memory_space<vmem>>, vector<1x48x32xbf16>
    %71 = vector.shape_cast %70 : vector<1x48x32xbf16> to vector<48x32xbf16>
    %cst_29 = arith.constant dense<0.000000e+00> : vector<16x32xf32>
    %72 = tpu.matmul %55, %71, %cst_29 {dimension_numbers = #tpu.dot_dimension_numbers<[1], [0], [0], [1], [0, 0, 1, 1], [], []>} : vector<16x48xbf16>, vector<48x32xbf16>, vector<16x32xf32> -> vector<16x32xf32>
    %73 = vector.extract_strided_slice %0 {offsets = [4, 0], sizes = [1, 32], strides = [1, 1]} : vector<10x32xf32> to vector<1x32xf32>
    %74 = vector.broadcast %73 : vector<1x32xf32> to vector<16x32xf32>
    %75 = arith.addf %72, %74 : vector<16x32xf32>
    %76 = tpu.iota {dimensions = array<i32: 0>} : vector<64x32xi32>
    %c0_i32 = arith.constant 0 : i32
    %77 = vector.broadcast %c0_i32 : i32 to vector<64x32xi32>
    %c16_i32 = arith.constant 16 : i32
    %78 = vector.broadcast %c16_i32 : i32 to vector<64x32xi32>
    %79 = arith.cmpi sge, %76, %78 : vector<64x32xi32>
    %80 = arith.extui %79 : vector<64x32xi1> to vector<64x32xi32>
    %81 = arith.addi %77, %80 : vector<64x32xi32>
    %c32_i32 = arith.constant 32 : i32
    %82 = vector.broadcast %c32_i32 : i32 to vector<64x32xi32>
    %83 = arith.cmpi sge, %76, %82 : vector<64x32xi32>
    %84 = arith.extui %83 : vector<64x32xi1> to vector<64x32xi32>
    %85 = arith.addi %81, %84 : vector<64x32xi32>
    %c48_i32 = arith.constant 48 : i32
    %86 = vector.broadcast %c48_i32 : i32 to vector<64x32xi32>
    %87 = arith.cmpi sge, %76, %86 : vector<64x32xi32>
    %88 = arith.extui %87 : vector<64x32xi1> to vector<64x32xi32>
    %89 = arith.addi %85, %88 : vector<64x32xi32>
    %90 = tpu.iota {dimensions = array<i32: 1>} : vector<64x32xi32>
    %c0_i32_30 = arith.constant 0 : i32
    %91 = vector.broadcast %c0_i32_30 : i32 to vector<64x32xi32>
    %c8_i32 = arith.constant 8 : i32
    %92 = vector.broadcast %c8_i32 : i32 to vector<64x32xi32>
    %93 = arith.cmpi sge, %90, %92 : vector<64x32xi32>
    %94 = arith.extui %93 : vector<64x32xi1> to vector<64x32xi32>
    %95 = arith.addi %91, %94 : vector<64x32xi32>
    %c16_i32_31 = arith.constant 16 : i32
    %96 = vector.broadcast %c16_i32_31 : i32 to vector<64x32xi32>
    %97 = arith.cmpi sge, %90, %96 : vector<64x32xi32>
    %98 = arith.extui %97 : vector<64x32xi1> to vector<64x32xi32>
    %99 = arith.addi %95, %98 : vector<64x32xi32>
    %c24_i32 = arith.constant 24 : i32
    %100 = vector.broadcast %c24_i32 : i32 to vector<64x32xi32>
    %101 = arith.cmpi sge, %90, %100 : vector<64x32xi32>
    %102 = arith.extui %101 : vector<64x32xi1> to vector<64x32xi32>
    %103 = arith.addi %99, %102 : vector<64x32xi32>
    %104 = arith.cmpi eq, %89, %103 : vector<64x32xi32>
    %105 = arith.extui %104 : vector<64x32xi1> to vector<64x32xi32>
    %106 = arith.sitofp %105 : vector<64x32xi32> to vector<64x32xf32>
    %107 = vector.shape_cast %69 : vector<16x32xf32> to vector<1x16x32xf32>
    %108 = vector.shape_cast %75 : vector<16x32xf32> to vector<1x16x32xf32>
    %109 = tpu.concatenate %107, %107, %107, %107 in 1 : vector<1x16x32xf32>, vector<1x16x32xf32>, vector<1x16x32xf32>, vector<1x16x32xf32> -> vector<1x64x32xf32>
    %110 = vector.shape_cast %106 : vector<64x32xf32> to vector<1x64x32xf32>
    %111 = arith.mulf %109, %110 : vector<1x64x32xf32>
    %112 = arith.truncf %111 : vector<1x64x32xf32> to vector<1x64x32xbf16>
    %113 = tpu.concatenate %108, %108, %108, %108 in 1 : vector<1x16x32xf32>, vector<1x16x32xf32>, vector<1x16x32xf32>, vector<1x16x32xf32> -> vector<1x64x32xf32>
    %114 = vector.shape_cast %106 : vector<64x32xf32> to vector<1x64x32xf32>
    %115 = arith.mulf %113, %114 : vector<1x64x32xf32>
    %116 = arith.truncf %115 : vector<1x64x32xf32> to vector<1x64x32xbf16>
    %117 = vector.shape_cast %63 : vector<8x32xf32> to vector<1x8x32xf32>
    %118 = arith.truncf %117 : vector<1x8x32xf32> to vector<1x8x32xbf16>
    "tpu.trace_start"() <{level = 10 : i32, message = "bqd,bkd->bqk"}> : () -> ()
    %cst_32 = arith.constant dense<0.000000e+00> : vector<1x8x64xf32>
    %119 = tpu.matmul %118, %112, %cst_32 {dimension_numbers = #tpu.dot_dimension_numbers<[2], [2], [1], [1], [0, 0, 0, 1, 1, 1], [0], [0]>} : vector<1x8x32xbf16>, vector<1x64x32xbf16>, vector<1x8x64xf32> -> vector<1x8x64xf32>
    "tpu.trace_stop"() : () -> ()
    %120 = vector.shape_cast %119 : vector<1x8x64xf32> to vector<8x64xf32>
    %cst_33 = arith.constant dense<0xFF800000> : vector<8xf32>
    %121 = vector.multi_reduction <maximumf>, %120, %cst_33 [1] : vector<8x64xf32> to vector<8xf32>
    %122 = vector.shape_cast %121 : vector<8xf32> to vector<8x1xf32>
    %123 = vector.broadcast %122 : vector<8x1xf32> to vector<8x64xf32>
    %124 = arith.subf %120, %123 : vector<8x64xf32>
    %125 = math.exp %124 : vector<8x64xf32>
    %126 = tpu.iota {dimensions = array<i32: 0>} : vector<64x64xi32>
    %c0_i32_34 = arith.constant 0 : i32
    %127 = vector.broadcast %c0_i32_34 : i32 to vector<64x64xi32>
    %c16_i32_35 = arith.constant 16 : i32
    %128 = vector.broadcast %c16_i32_35 : i32 to vector<64x64xi32>
    %129 = arith.cmpi sge, %126, %128 : vector<64x64xi32>
    %130 = arith.extui %129 : vector<64x64xi1> to vector<64x64xi32>
    %131 = arith.addi %127, %130 : vector<64x64xi32>
    %c32_i32_36 = arith.constant 32 : i32
    %132 = vector.broadcast %c32_i32_36 : i32 to vector<64x64xi32>
    %133 = arith.cmpi sge, %126, %132 : vector<64x64xi32>
    %134 = arith.extui %133 : vector<64x64xi1> to vector<64x64xi32>
    %135 = arith.addi %131, %134 : vector<64x64xi32>
    %c48_i32_37 = arith.constant 48 : i32
    %136 = vector.broadcast %c48_i32_37 : i32 to vector<64x64xi32>
    %137 = arith.cmpi sge, %126, %136 : vector<64x64xi32>
    %138 = arith.extui %137 : vector<64x64xi1> to vector<64x64xi32>
    %139 = arith.addi %135, %138 : vector<64x64xi32>
    %140 = tpu.iota {dimensions = array<i32: 1>} : vector<64x64xi32>
    %c0_i32_38 = arith.constant 0 : i32
    %141 = vector.broadcast %c0_i32_38 : i32 to vector<64x64xi32>
    %c16_i32_39 = arith.constant 16 : i32
    %142 = vector.broadcast %c16_i32_39 : i32 to vector<64x64xi32>
    %143 = arith.cmpi sge, %140, %142 : vector<64x64xi32>
    %144 = arith.extui %143 : vector<64x64xi1> to vector<64x64xi32>
    %145 = arith.addi %141, %144 : vector<64x64xi32>
    %c32_i32_40 = arith.constant 32 : i32
    %146 = vector.broadcast %c32_i32_40 : i32 to vector<64x64xi32>
    %147 = arith.cmpi sge, %140, %146 : vector<64x64xi32>
    %148 = arith.extui %147 : vector<64x64xi1> to vector<64x64xi32>
    %149 = arith.addi %145, %148 : vector<64x64xi32>
    %c48_i32_41 = arith.constant 48 : i32
    %150 = vector.broadcast %c48_i32_41 : i32 to vector<64x64xi32>
    %151 = arith.cmpi sge, %140, %150 : vector<64x64xi32>
    %152 = arith.extui %151 : vector<64x64xi1> to vector<64x64xi32>
    %153 = arith.addi %149, %152 : vector<64x64xi32>
    %154 = arith.cmpi eq, %139, %153 : vector<64x64xi32>
    %155 = arith.extui %154 : vector<64x64xi1> to vector<64x64xi32>
    %156 = arith.sitofp %155 : vector<64x64xi32> to vector<64x64xf32>
    %cst_42 = arith.constant dense<0.000000e+00> : vector<8x64xf32>
    %157 = tpu.matmul %125, %156, %cst_42 {dimension_numbers = #tpu.dot_dimension_numbers<[1], [0], [0], [1], [0, 0, 1, 1], [], []>} : vector<8x64xf32>, vector<64x64xf32>, vector<8x64xf32> -> vector<8x64xf32>
    %cst_43 = arith.constant 1.000000e-30 : f32
    %158 = vector.broadcast %cst_43 : f32 to vector<8x64xf32>
    %159 = arith.maximumf %157, %158 : vector<8x64xf32>
    %160 = tpu.reciprocal %159 {approx = true} : vector<8x64xf32> -> vector<8x64xf32>
    %161 = arith.mulf %125, %160 : vector<8x64xf32>
    %162 = tpu.iota {dimensions = array<i32: 0>} : vector<64x16xi32>
    %c0_i32_44 = arith.constant 0 : i32
    %163 = vector.broadcast %c0_i32_44 : i32 to vector<64x16xi32>
    %c16_i32_45 = arith.constant 16 : i32
    %164 = vector.broadcast %c16_i32_45 : i32 to vector<64x16xi32>
    %165 = arith.cmpi sge, %162, %164 : vector<64x16xi32>
    %166 = arith.extui %165 : vector<64x16xi1> to vector<64x16xi32>
    %167 = arith.addi %163, %166 : vector<64x16xi32>
    %c32_i32_46 = arith.constant 32 : i32
    %168 = vector.broadcast %c32_i32_46 : i32 to vector<64x16xi32>
    %169 = arith.cmpi sge, %162, %168 : vector<64x16xi32>
    %170 = arith.extui %169 : vector<64x16xi1> to vector<64x16xi32>
    %171 = arith.addi %167, %170 : vector<64x16xi32>
    %c48_i32_47 = arith.constant 48 : i32
    %172 = vector.broadcast %c48_i32_47 : i32 to vector<64x16xi32>
    %173 = arith.cmpi sge, %162, %172 : vector<64x16xi32>
    %174 = arith.extui %173 : vector<64x16xi1> to vector<64x16xi32>
    %175 = arith.addi %171, %174 : vector<64x16xi32>
    %176 = tpu.iota {dimensions = array<i32: 0>} : vector<64x16xi32>
    %c16_i32_48 = arith.constant 16 : i32
    %177 = vector.broadcast %c16_i32_48 : i32 to vector<64x16xi32>
    %178 = arith.muli %177, %175 : vector<64x16xi32>
    %179 = arith.subi %176, %178 : vector<64x16xi32>
    %180 = tpu.iota {dimensions = array<i32: 1>} : vector<64x16xi32>
    %181 = arith.cmpi eq, %179, %180 : vector<64x16xi32>
    %cst_49 = arith.constant 2.500000e-01 : f32
    %cst_50 = arith.constant 0.000000e+00 : f32
    %182 = vector.broadcast %cst_49 : f32 to vector<64x16xf32>
    %183 = vector.broadcast %cst_50 : f32 to vector<64x16xf32>
    %184 = arith.select %181, %182, %183 : vector<64x16xi1>, vector<64x16xf32>
    %cst_51 = arith.constant dense<0.000000e+00> : vector<8x16xf32>
    %185 = tpu.matmul %161, %184, %cst_51 {dimension_numbers = #tpu.dot_dimension_numbers<[1], [0], [0], [1], [0, 0, 1, 1], [], []>} : vector<8x64xf32>, vector<64x16xf32>, vector<8x16xf32> -> vector<8x16xf32>
    %186 = vector.shape_cast %185 : vector<8x16xf32> to vector<1x8x16xf32>
    %187 = vector.extract_strided_slice %186 {offsets = [0, 0, 0], sizes = [1, 1, 16], strides = [1, 1, 1]} : vector<1x8x16xf32> to vector<1x1x16xf32>
    %c0_52 = arith.constant 0 : index
    %c0_53 = arith.constant 0 : index
    %c0_54 = arith.constant 0 : index
    %188 = vector.load %arg8[%c0_52, %c0_53, %c0_54] : memref<1x1x128xf32, #tpu.memory_space<vmem>>, vector<1x1x16xf32>
    tpu.vector_store %arg8[%c0_52, %c0_53, %c0_54], %187 {strides = array<i32>} : memref<1x1x128xf32, #tpu.memory_space<vmem>>, vector<1x1x16xf32>,
    %189 = vector.extract_strided_slice %186 {offsets = [0, 1, 0], sizes = [1, 1, 16], strides = [1, 1, 1]} : vector<1x8x16xf32> to vector<1x1x16xf32>
    %c0_55 = arith.constant 0 : index
    %c0_56 = arith.constant 0 : index
    %c16 = arith.constant 16 : index
    %190 = vector.load %arg8[%c0_55, %c0_56, %c16] : memref<1x1x128xf32, #tpu.memory_space<vmem>>, vector<1x1x16xf32>
    tpu.vector_store %arg8[%c0_55, %c0_56, %c16], %189 {strides = array<i32>} : memref<1x1x128xf32, #tpu.memory_space<vmem>>, vector<1x1x16xf32>,
    %191 = vector.extract_strided_slice %186 {offsets = [0, 2, 0], sizes = [1, 1, 16], strides = [1, 1, 1]} : vector<1x8x16xf32> to vector<1x1x16xf32>
    %c0_57 = arith.constant 0 : index
    %c0_58 = arith.constant 0 : index
    %c32 = arith.constant 32 : index
    %192 = vector.load %arg8[%c0_57, %c0_58, %c32] : memref<1x1x128xf32, #tpu.memory_space<vmem>>, vector<1x1x16xf32>
    tpu.vector_store %arg8[%c0_57, %c0_58, %c32], %191 {strides = array<i32>} : memref<1x1x128xf32, #tpu.memory_space<vmem>>, vector<1x1x16xf32>,
    %193 = vector.extract_strided_slice %186 {offsets = [0, 3, 0], sizes = [1, 1, 16], strides = [1, 1, 1]} : vector<1x8x16xf32> to vector<1x1x16xf32>
    %c0_59 = arith.constant 0 : index
    %c0_60 = arith.constant 0 : index
    %c48 = arith.constant 48 : index
    %194 = vector.load %arg8[%c0_59, %c0_60, %c48] : memref<1x1x128xf32, #tpu.memory_space<vmem>>, vector<1x1x16xf32>
    tpu.vector_store %arg8[%c0_59, %c0_60, %c48], %193 {strides = array<i32>} : memref<1x1x128xf32, #tpu.memory_space<vmem>>, vector<1x1x16xf32>,
    %195 = vector.extract_strided_slice %186 {offsets = [0, 4, 0], sizes = [1, 1, 16], strides = [1, 1, 1]} : vector<1x8x16xf32> to vector<1x1x16xf32>
    %c0_61 = arith.constant 0 : index
    %c0_62 = arith.constant 0 : index
    %c64 = arith.constant 64 : index
    %196 = vector.load %arg8[%c0_61, %c0_62, %c64] : memref<1x1x128xf32, #tpu.memory_space<vmem>>, vector<1x1x16xf32>
    tpu.vector_store %arg8[%c0_61, %c0_62, %c64], %195 {strides = array<i32>} : memref<1x1x128xf32, #tpu.memory_space<vmem>>, vector<1x1x16xf32>,
    %197 = vector.extract_strided_slice %186 {offsets = [0, 5, 0], sizes = [1, 1, 16], strides = [1, 1, 1]} : vector<1x8x16xf32> to vector<1x1x16xf32>
    %c0_63 = arith.constant 0 : index
    %c0_64 = arith.constant 0 : index
    %c80 = arith.constant 80 : index
    %198 = vector.load %arg8[%c0_63, %c0_64, %c80] : memref<1x1x128xf32, #tpu.memory_space<vmem>>, vector<1x1x16xf32>
    tpu.vector_store %arg8[%c0_63, %c0_64, %c80], %197 {strides = array<i32>} : memref<1x1x128xf32, #tpu.memory_space<vmem>>, vector<1x1x16xf32>,
    %199 = vector.extract_strided_slice %186 {offsets = [0, 6, 0], sizes = [1, 1, 16], strides = [1, 1, 1]} : vector<1x8x16xf32> to vector<1x1x16xf32>
    %c0_65 = arith.constant 0 : index
    %c0_66 = arith.constant 0 : index
    %c96 = arith.constant 96 : index
    %200 = vector.load %arg8[%c0_65, %c0_66, %c96] : memref<1x1x128xf32, #tpu.memory_space<vmem>>, vector<1x1x16xf32>
    tpu.vector_store %arg8[%c0_65, %c0_66, %c96], %199 {strides = array<i32>} : memref<1x1x128xf32, #tpu.memory_space<vmem>>, vector<1x1x16xf32>,
    %201 = vector.extract_strided_slice %186 {offsets = [0, 7, 0], sizes = [1, 1, 16], strides = [1, 1, 1]} : vector<1x8x16xf32> to vector<1x1x16xf32>
    %c0_67 = arith.constant 0 : index
    %c0_68 = arith.constant 0 : index
    %c112 = arith.constant 112 : index
    %202 = vector.load %arg8[%c0_67, %c0_68, %c112] : memref<1x1x128xf32, #tpu.memory_space<vmem>>, vector<1x1x16xf32>
    tpu.vector_store %arg8[%c0_67, %c0_68, %c112], %201 {strides = array<i32>} : memref<1x1x128xf32, #tpu.memory_space<vmem>>, vector<1x1x16xf32>,
    %203 = vector.shape_cast %161 : vector<8x64xf32> to vector<1x8x64xf32>
    %204 = arith.truncf %203 : vector<1x8x64xf32> to vector<1x8x64xbf16>
    "tpu.trace_start"() <{level = 10 : i32, message = "bqk,bkd->bqd"}> : () -> ()
    %cst_69 = arith.constant dense<0.000000e+00> : vector<1x8x32xf32>
    %205 = tpu.matmul %204, %116, %cst_69 {dimension_numbers = #tpu.dot_dimension_numbers<[2], [1], [1], [2], [0, 0, 0, 1, 1, 2], [0], [0]>} : vector<1x8x64xbf16>, vector<1x64x32xbf16>, vector<1x8x32xf32> -> vector<1x8x32xf32>
    "tpu.trace_stop"() : () -> ()
    %206 = vector.shape_cast %205 : vector<1x8x32xf32> to vector<8x32xf32>
    %207 = arith.truncf %206 : vector<8x32xf32> to vector<8x32xbf16>
    %c0_70 = arith.constant 0 : index
    %c0_71 = arith.constant 0 : index
    %c0_72 = arith.constant 0 : index
    %208 = vector.load %arg1[%c0_70, %c0_71, %c0_72] : memref<1x8x32xf32, #tpu.memory_space<vmem>>, vector<1x8x32xf32>
    %209 = vector.shape_cast %208 : vector<1x8x32xf32> to vector<8x32xf32>
    %c1_73 = arith.constant 1 : index
    %c0_74 = arith.constant 0 : index
    %c0_75 = arith.constant 0 : index
    %210 = vector.load %arg5[%c1_73, %c0_74, %c0_75] : memref<4x32x32xbf16, #tpu.memory_space<vmem>>, vector<1x32x32xbf16>
    %211 = vector.shape_cast %210 : vector<1x32x32xbf16> to vector<32x32xbf16>
    %cst_76 = arith.constant dense<0.000000e+00> : vector<8x32xf32>
    %212 = tpu.matmul %207, %211, %cst_76 {dimension_numbers = #tpu.dot_dimension_numbers<[1], [0], [0], [1], [0, 0, 1, 1], [], []>} : vector<8x32xbf16>, vector<32x32xbf16>, vector<8x32xf32> -> vector<8x32xf32>
    %213 = vector.extract_strided_slice %0 {offsets = [5, 0], sizes = [1, 32], strides = [1, 1]} : vector<10x32xf32> to vector<1x32xf32>
    %214 = vector.broadcast %213 : vector<1x32xf32> to vector<8x32xf32>
    %215 = arith.addf %212, %214 : vector<8x32xf32>
    %216 = arith.addf %215, %209 : vector<8x32xf32>
    %217 = vector.extract_strided_slice %0 {offsets = [6, 0], sizes = [1, 32], strides = [1, 1]} : vector<10x32xf32> to vector<1x32xf32>
    %218 = vector.extract_strided_slice %0 {offsets = [7, 0], sizes = [1, 32], strides = [1, 1]} : vector<10x32xf32> to vector<1x32xf32>
    %cst_77 = arith.constant dense<0.000000e+00> : vector<8xf32>
    %219 = vector.multi_reduction <add>, %216, %cst_77 [1] : vector<8x32xf32> to vector<8xf32>
    %220 = vector.shape_cast %219 : vector<8xf32> to vector<8x1xf32>
    %cst_78 = arith.constant 3.200000e+01 : f32
    %221 = vector.broadcast %cst_78 : f32 to vector<8x1xf32>
    %222 = arith.divf %220, %221 : vector<8x1xf32>
    %223 = vector.broadcast %222 : vector<8x1xf32> to vector<8x32xf32>
    %224 = arith.subf %216, %223 : vector<8x32xf32>
    %225 = arith.mulf %224, %224 : vector<8x32xf32>
    %cst_79 = arith.constant dense<0.000000e+00> : vector<8xf32>
    %226 = vector.multi_reduction <add>, %225, %cst_79 [1] : vector<8x32xf32> to vector<8xf32>
    %227 = vector.shape_cast %226 : vector<8xf32> to vector<8x1xf32>
    %cst_80 = arith.constant 3.200000e+01 : f32
    %228 = vector.broadcast %cst_80 : f32 to vector<8x1xf32>
    %229 = arith.divf %227, %228 : vector<8x1xf32>
    %230 = vector.broadcast %222 : vector<8x1xf32> to vector<8x32xf32>
    %231 = arith.subf %216, %230 : vector<8x32xf32>
    %cst_81 = arith.constant 9.99999974E-6 : f32
    %232 = vector.broadcast %cst_81 : f32 to vector<8x1xf32>
    %233 = arith.addf %229, %232 : vector<8x1xf32>
    %234 = math.rsqrt %233 : vector<8x1xf32>
    %235 = vector.broadcast %234 : vector<8x1xf32> to vector<8x32xf32>
    %236 = arith.mulf %231, %235 : vector<8x32xf32>
    %237 = vector.broadcast %217 : vector<1x32xf32> to vector<8x32xf32>
    %238 = arith.mulf %236, %237 : vector<8x32xf32>
    %239 = vector.broadcast %218 : vector<1x32xf32> to vector<8x32xf32>
    %240 = arith.addf %238, %239 : vector<8x32xf32>
    %241 = arith.truncf %240 : vector<8x32xf32> to vector<8x32xbf16>
    %c2 = arith.constant 2 : index
    %c0_82 = arith.constant 0 : index
    %c0_83 = arith.constant 0 : index
    %242 = vector.load %arg5[%c2, %c0_82, %c0_83] : memref<4x32x32xbf16, #tpu.memory_space<vmem>>, vector<1x32x32xbf16>
    %243 = vector.shape_cast %242 : vector<1x32x32xbf16> to vector<32x32xbf16>
    %cst_84 = arith.constant dense<0.000000e+00> : vector<8x32xf32>
    %244 = tpu.matmul %241, %243, %cst_84 {dimension_numbers = #tpu.dot_dimension_numbers<[1], [0], [0], [1], [0, 0, 1, 1], [], []>} : vector<8x32xbf16>, vector<32x32xbf16>, vector<8x32xf32> -> vector<8x32xf32>
    %245 = vector.extract_strided_slice %0 {offsets = [8, 0], sizes = [1, 32], strides = [1, 1]} : vector<10x32xf32> to vector<1x32xf32>
    %246 = vector.broadcast %245 : vector<1x32xf32> to vector<8x32xf32>
    %247 = arith.addf %244, %246 : vector<8x32xf32>
    %cst_85 = arith.constant 5.000000e-01 : f32
    %248 = vector.broadcast %cst_85 : f32 to vector<8x32xf32>
    %249 = arith.mulf %248, %247 : vector<8x32xf32>
    %cst_86 = arith.constant 0.707106769 : f32
    %250 = vector.broadcast %cst_86 : f32 to vector<8x32xf32>
    %251 = arith.mulf %247, %250 : vector<8x32xf32>
    %cst_87 = arith.constant 0.000000e+00 : f32
    %252 = vector.broadcast %cst_87 : f32 to vector<8x32xf32>
    %253 = arith.cmpf oge, %251, %252 : vector<8x32xf32>
    %cst_88 = arith.constant 1.000000e+00 : f32
    %cst_89 = arith.constant -1.000000e+00 : f32
    %254 = vector.broadcast %cst_88 : f32 to vector<8x32xf32>
    %255 = vector.broadcast %cst_89 : f32 to vector<8x32xf32>
    %256 = arith.select %253, %254, %255 : vector<8x32xi1>, vector<8x32xf32>
    %257 = math.absf %251 : vector<8x32xf32>
    %cst_90 = arith.constant 0.327591091 : f32
    %258 = vector.broadcast %cst_90 : f32 to vector<8x32xf32>
    %259 = arith.mulf %258, %257 : vector<8x32xf32>
    %cst_91 = arith.constant 1.000000e+00 : f32
    %260 = vector.broadcast %cst_91 : f32 to vector<8x32xf32>
    %261 = arith.addf %260, %259 : vector<8x32xf32>
    %262 = tpu.reciprocal %261 {approx = true} : vector<8x32xf32> -> vector<8x32xf32>
    %cst_92 = arith.constant 1.06140542 : f32
    %263 = vector.broadcast %cst_92 : f32 to vector<8x32xf32>
    %264 = arith.mulf %263, %262 : vector<8x32xf32>
    %cst_93 = arith.constant -1.45315206 : f32
    %265 = vector.broadcast %cst_93 : f32 to vector<8x32xf32>
    %266 = arith.addf %264, %265 : vector<8x32xf32>
    %267 = arith.mulf %266, %262 : vector<8x32xf32>
    %cst_94 = arith.constant 1.42141378 : f32
    %268 = vector.broadcast %cst_94 : f32 to vector<8x32xf32>
    %269 = arith.addf %267, %268 : vector<8x32xf32>
    %270 = arith.mulf %269, %262 : vector<8x32xf32>
    %cst_95 = arith.constant -0.284496725 : f32
    %271 = vector.broadcast %cst_95 : f32 to vector<8x32xf32>
    %272 = arith.addf %270, %271 : vector<8x32xf32>
    %273 = arith.mulf %272, %262 : vector<8x32xf32>
    %cst_96 = arith.constant 0.254829586 : f32
    %274 = vector.broadcast %cst_96 : f32 to vector<8x32xf32>
    %275 = arith.addf %273, %274 : vector<8x32xf32>
    %276 = arith.mulf %275, %262 : vector<8x32xf32>
    %cst_97 = arith.constant 0.000000e+00 : f32
    %277 = vector.broadcast %cst_97 : f32 to vector<8x32xf32>
    %278 = arith.subf %277, %257 : vector<8x32xf32>
    %279 = arith.mulf %278, %257 : vector<8x32xf32>
    %280 = math.exp %279 : vector<8x32xf32>
    %281 = arith.mulf %276, %280 : vector<8x32xf32>
    %cst_98 = arith.constant 1.000000e+00 : f32
    %282 = vector.broadcast %cst_98 : f32 to vector<8x32xf32>
    %283 = arith.subf %282, %281 : vector<8x32xf32>
    %284 = arith.mulf %256, %283 : vector<8x32xf32>
    %cst_99 = arith.constant 1.000000e+00 : f32
    %285 = vector.broadcast %cst_99 : f32 to vector<8x32xf32>
    %286 = arith.addf %285, %284 : vector<8x32xf32>
    %287 = arith.mulf %249, %286 : vector<8x32xf32>
    %288 = arith.truncf %287 : vector<8x32xf32> to vector<8x32xbf16>
    %c3 = arith.constant 3 : index
    %c0_100 = arith.constant 0 : index
    %c0_101 = arith.constant 0 : index
    %289 = vector.load %arg5[%c3, %c0_100, %c0_101] : memref<4x32x32xbf16, #tpu.memory_space<vmem>>, vector<1x32x32xbf16>
    %290 = vector.shape_cast %289 : vector<1x32x32xbf16> to vector<32x32xbf16>
    %cst_102 = arith.constant dense<0.000000e+00> : vector<8x32xf32>
    %291 = tpu.matmul %288, %290, %cst_102 {dimension_numbers = #tpu.dot_dimension_numbers<[1], [0], [0], [1], [0, 0, 1, 1], [], []>} : vector<8x32xbf16>, vector<32x32xbf16>, vector<8x32xf32> -> vector<8x32xf32>
    %292 = vector.extract_strided_slice %0 {offsets = [9, 0], sizes = [1, 32], strides = [1, 1]} : vector<10x32xf32> to vector<1x32xf32>
    %293 = vector.broadcast %292 : vector<1x32xf32> to vector<8x32xf32>
    %294 = arith.addf %291, %293 : vector<8x32xf32>
    %295 = arith.addf %216, %294 : vector<8x32xf32>
    %296 = vector.shape_cast %295 : vector<8x32xf32> to vector<1x8x32xf32>
    %297 = vector.extract_strided_slice %296 {offsets = [0, 0, 0], sizes = [1, 1, 32], strides = [1, 1, 1]} : vector<1x8x32xf32> to vector<1x1x32xf32>
    %c0_103 = arith.constant 0 : index
    %c0_104 = arith.constant 0 : index
    %c0_105 = arith.constant 0 : index
    %298 = vector.load %arg7[%c0_103, %c0_104, %c0_105] : memref<1x1x256xf32, #tpu.memory_space<vmem>>, vector<1x1x32xf32>
    tpu.vector_store %arg7[%c0_103, %c0_104, %c0_105], %297 {strides = array<i32>} : memref<1x1x256xf32, #tpu.memory_space<vmem>>, vector<1x1x32xf32>,
    %299 = vector.extract_strided_slice %296 {offsets = [0, 1, 0], sizes = [1, 1, 32], strides = [1, 1, 1]} : vector<1x8x32xf32> to vector<1x1x32xf32>
    %c0_106 = arith.constant 0 : index
    %c0_107 = arith.constant 0 : index
    %c32_108 = arith.constant 32 : index
    %300 = vector.load %arg7[%c0_106, %c0_107, %c32_108] : memref<1x1x256xf32, #tpu.memory_space<vmem>>, vector<1x1x32xf32>
    tpu.vector_store %arg7[%c0_106, %c0_107, %c32_108], %299 {strides = array<i32>} : memref<1x1x256xf32, #tpu.memory_space<vmem>>, vector<1x1x32xf32>,
    %301 = vector.extract_strided_slice %296 {offsets = [0, 2, 0], sizes = [1, 1, 32], strides = [1, 1, 1]} : vector<1x8x32xf32> to vector<1x1x32xf32>
    %c0_109 = arith.constant 0 : index
    %c0_110 = arith.constant 0 : index
    %c64_111 = arith.constant 64 : index
    %302 = vector.load %arg7[%c0_109, %c0_110, %c64_111] : memref<1x1x256xf32, #tpu.memory_space<vmem>>, vector<1x1x32xf32>
    tpu.vector_store %arg7[%c0_109, %c0_110, %c64_111], %301 {strides = array<i32>} : memref<1x1x256xf32, #tpu.memory_space<vmem>>, vector<1x1x32xf32>,
    %303 = vector.extract_strided_slice %296 {offsets = [0, 3, 0], sizes = [1, 1, 32], strides = [1, 1, 1]} : vector<1x8x32xf32> to vector<1x1x32xf32>
    %c0_112 = arith.constant 0 : index
    %c0_113 = arith.constant 0 : index
    %c96_114 = arith.constant 96 : index
    %304 = vector.load %arg7[%c0_112, %c0_113, %c96_114] : memref<1x1x256xf32, #tpu.memory_space<vmem>>, vector<1x1x32xf32>
    tpu.vector_store %arg7[%c0_112, %c0_113, %c96_114], %303 {strides = array<i32>} : memref<1x1x256xf32, #tpu.memory_space<vmem>>, vector<1x1x32xf32>,
    %305 = vector.extract_strided_slice %296 {offsets = [0, 4, 0], sizes = [1, 1, 32], strides = [1, 1, 1]} : vector<1x8x32xf32> to vector<1x1x32xf32>
    %c0_115 = arith.constant 0 : index
    %c0_116 = arith.constant 0 : index
    %c128 = arith.constant 128 : index
    %306 = vector.load %arg7[%c0_115, %c0_116, %c128] : memref<1x1x256xf32, #tpu.memory_space<vmem>>, vector<1x1x32xf32>
    tpu.vector_store %arg7[%c0_115, %c0_116, %c128], %305 {strides = array<i32>} : memref<1x1x256xf32, #tpu.memory_space<vmem>>, vector<1x1x32xf32>,
    %307 = vector.extract_strided_slice %296 {offsets = [0, 5, 0], sizes = [1, 1, 32], strides = [1, 1, 1]} : vector<1x8x32xf32> to vector<1x1x32xf32>
    %c0_117 = arith.constant 0 : index
    %c0_118 = arith.constant 0 : index
    %c160 = arith.constant 160 : index
    %308 = vector.load %arg7[%c0_117, %c0_118, %c160] : memref<1x1x256xf32, #tpu.memory_space<vmem>>, vector<1x1x32xf32>
    tpu.vector_store %arg7[%c0_117, %c0_118, %c160], %307 {strides = array<i32>} : memref<1x1x256xf32, #tpu.memory_space<vmem>>, vector<1x1x32xf32>,
    %309 = vector.extract_strided_slice %296 {offsets = [0, 6, 0], sizes = [1, 1, 32], strides = [1, 1, 1]} : vector<1x8x32xf32> to vector<1x1x32xf32>
    %c0_119 = arith.constant 0 : index
    %c0_120 = arith.constant 0 : index
    %c192 = arith.constant 192 : index
    %310 = vector.load %arg7[%c0_119, %c0_120, %c192] : memref<1x1x256xf32, #tpu.memory_space<vmem>>, vector<1x1x32xf32>
    tpu.vector_store %arg7[%c0_119, %c0_120, %c192], %309 {strides = array<i32>} : memref<1x1x256xf32, #tpu.memory_space<vmem>>, vector<1x1x32xf32>,
    %311 = vector.extract_strided_slice %296 {offsets = [0, 7, 0], sizes = [1, 1, 32], strides = [1, 1, 1]} : vector<1x8x32xf32> to vector<1x1x32xf32>
    %c0_121 = arith.constant 0 : index
    %c0_122 = arith.constant 0 : index
    %c224 = arith.constant 224 : index
    %312 = vector.load %arg7[%c0_121, %c0_122, %c224] : memref<1x1x256xf32, #tpu.memory_space<vmem>>, vector<1x1x32xf32>
    tpu.vector_store %arg7[%c0_121, %c0_122, %c224], %311 {strides = array<i32>} : memref<1x1x256xf32, #tpu.memory_space<vmem>>, vector<1x1x32xf32>,
    return
  }
  func.func @transform_0(%arg0: i32) -> (i32, i32, i32) {
    %c0_i32 = arith.constant 0 : i32
    %c0_i32_0 = arith.constant 0 : i32
    %c0_i32_1 = arith.constant 0 : i32
    return %arg0, %c0_i32, %c0_i32_0 : i32, i32, i32
  }
  func.func @transform_1(%arg0: i32) -> (i32, i32, i32) {
    %c0_i32 = arith.constant 0 : i32
    %c0_i32_0 = arith.constant 0 : i32
    %c0_i32_1 = arith.constant 0 : i32
    return %arg0, %c0_i32, %c0_i32_0 : i32, i32, i32
  }
  func.func @transform_2(%arg0: i32) -> (i32, i32) {
    %c0_i32 = arith.constant 0 : i32
    %c0_i32_0 = arith.constant 0 : i32
    %c0_i32_1 = arith.constant 0 : i32
    return %c0_i32, %c0_i32_0 : i32, i32
  }
  func.func @transform_3(%arg0: i32) -> (i32, i32) {
    %c0_i32 = arith.constant 0 : i32
    %c0_i32_0 = arith.constant 0 : i32
    %c0_i32_1 = arith.constant 0 : i32
    return %c0_i32, %c0_i32_0 : i32, i32
  }
  func.func @transform_4(%arg0: i32) -> (i32, i32, i32) {
    %c0_i32 = arith.constant 0 : i32
    %c0_i32_0 = arith.constant 0 : i32
    %c0_i32_1 = arith.constant 0 : i32
    %c0_i32_2 = arith.constant 0 : i32
    return %c0_i32, %c0_i32_0, %c0_i32_1 : i32, i32, i32
  }
  func.func @transform_5(%arg0: i32) -> (i32, i32, i32) {
    %c0_i32 = arith.constant 0 : i32
    %c0_i32_0 = arith.constant 0 : i32
    %c0_i32_1 = arith.constant 0 : i32
    %c0_i32_2 = arith.constant 0 : i32
    return %c0_i32, %c0_i32_0, %c0_i32_1 : i32, i32, i32
  }
  func.func @transform_6(%arg0: i32) -> (i32, i32, i32) {
    %c0_i32 = arith.constant 0 : i32
    %c0_i32_0 = arith.constant 0 : i32
    %c0_i32_1 = arith.constant 0 : i32
    return %arg0, %c0_i32, %c0_i32_0 : i32, i32, i32
  }
  func.func @transform_7(%arg0: i32) -> (i32, i32, i32) {
    %c0_i32 = arith.constant 0 : i32
    %c0_i32_0 = arith.constant 0 : i32
    %c0_i32_1 = arith.constant 0 : i32
    return %arg0, %c0_i32, %c0_i32_0 : i32, i32, i32
  }
}

</mosaic_0001>

<bundles_post_ra>
// kernel: tpu_custom_call.1
= control target key start
LH: loop header
LB: loop body
LE: loop exit
PB: predicated region body
PF: predicated region fallthrough
CT: control target
= control target key end

     0   :  { %s2681_s0 = inlined_call_operand.vmem [shape: f32[2,8,32], index: 0, kind: input, shape index: {}]   ;;  %s2682_s1 = inlined_call_operand.hbm [shape: f32[2,16,48], index: 1, kind: input, shape index: {}]   ;;  %s2683_s2 = inlined_call_operand.hbm [shape: f32[10,32], index: 2, kind: input, shape index: {}]   ;;  %s2684_s3 = inlined_call_operand.vmem [shape: f32[2,48], index: 3, kind: input, shape index: {}]   ;;  %s2685_s4 = inlined_call_operand.vmem [shape: bf16[4,32,32], index: 4, kind: input, shape index: {}]   ;;  %s2686_s5 = inlined_call_operand.vmem [shape: bf16[2,48,32], index: 5, kind: input, shape index: {}]   ;;  %s2687_s6 = inlined_call_operand.hbm [shape: f32[2,1,256], index: 6, kind: output, shape index: {0}]   ;;  %s2688_s7 = inlined_call_operand.hbm [shape: f32[2,1,128], index: 7, kind: output, shape index: {1}]  }
   0x1   :  { %2698 = sst [smem:[#allocation14_spill]] %s2683_s2 }
   0x2   :  { %13 = vsyncpa [#allocation3], 0 }
   0x3   :  { %15 = vsyncpa [#allocation3 + $0x1], 0 }
   0x4   :  { %16 = vsyncpa [#allocation6], 0 }
   0x5   :  { %17 = vsyncpa [#allocation4], 0 }
   0x6   :  { %19 = vsyncpa [#allocation4 + $0x1], 0 }
   0x7   :  { %20 = vsyncpa [#allocation9], 0 }
   0x8   :  { %22 = vsyncpa [#allocation9 + $0x1], 0  ;;  %s2195_s24 = smov 0   ;;  %s2197_s25 = smov 0  }
   0x9   :  { %s2199_s26 = smov 0   ;;  %s2201_s27 = smov 0  }
   0xa LB: > { %s2216_s28 = sadd.s32 4294967295, %s2133_s27   ;;  %s1595_s29 = sadd.s32 4294967294, %s2133_s27   ;;  %s2133_s27 = sphi %s2201_s27, %s2729_s27   ;;  %s2129_s26 = sphi %s2199_s26, %s2728_s26   ;;  %s2125_s25 = sphi %s2197_s25, %s2727_s25   ;;  %s2121_s24 = sphi %s2195_s24, %s2726_s24  }
   0xb   : > { %p74_p0 = scmp.ne.s32.totalorder %s2125_s25, %s2121_s24  ;;  %p2690_p1 = scmp.eq.s32.totalorder %s2216_s28, 0 }
   0xc   : > { %p188_p3 = scmp.eq.s32.totalorder %s1595_s29, 1  ;;  %p1596_p5 = scmp.ge.s32.totalorder %s2133_s27, 1 }
   0xd   : > { %p2225_p4 = por %p2690_p1, %p74_p0  ;;  %p221_p7 = scmp.lt.s32.totalorder %s2133_s27, 3 }
   0xe   : > { %p2230_p6 = por %p188_p3, %p74_p0  ;;  %s2135_s10 = smov [#allocation5]  }
   0xf   : > { %s2699_s30 = scalar_select %p2225_p4, 1, 0 }
  0x10   : > { %s2700_s8 = scalar_select %p2230_p6, 1, 0 }
  0x11   : > { %p2235_p8 = pnand %p1596_p5, %p221_p7  ;;  %s233_s11 = sshll.u32 %s2135_s10, 4  ;;  %s234_s11 = int_to_ptr.vmem [resolvable:$true] %s233_s11 }
  0x12   : > { %s2249_s13 = sadd.s32 1, %s2133_s27   ;;  %s61_s14 = sadd.s32 1, %s2129_s26 }
  0x13   : > { %s2701_s9 = scalar_select %p2235_p8, 1, 0 }
  0x14   : > { %p1883_p9 = pneg %p2235_p8  ;;  %s58_s15 = ssub.s32 %s2133_s27, %s2249_s13 }
  0x15   : > { %s1992_s16 = scalar_lea.vmem %s234_s11, 256  ;;  %p2000_p5 = scmp.lt.s32.totalorder %s234_s11, %s234_s11 }
  0x16   : > { %p2244_p11 = pnand %p1883_p9, %p2690_p1  ;;  %p1993_p13 = scmp.ne.s32.totalorder %s234_s11, %s1992_s16 }
  0x17   : > { %p2001_p7 = scmp.lt.s32.totalorder %s1992_s16, %s1992_s16 }
  0x18   : > { %p1983_p12 = pneg %p2244_p11 }
  0x19   : > { %p2002_p10 = por %p2001_p7, %p2000_p5 }
  0x1a   : > { %p1995_p0 = pnand %p1993_p13, %p1983_p12 }
  0x1c   : > { %p1996_p3 = pneg %p1995_p0 }
  0x1e   : > { %p2003_p2 = pnand %p2002_p10, %p1996_p3 }
  0x20   : > { %2006 = shalt.err (!%p2003_p2)
}
  0x21   : > { %s2689_s17 = smov 128   ;;  %s2691_s18 = smov 8  }
  0x22   : > { %s2703_s2 = sld [smem:[#allocation14_spill]]  ;;  %p59_p2 = scmp.eq.s32.totalorder %s58_s15, 0 }
  0x23   : > { %p68_p9 = scmp.ne.s32.totalorder %s2129_s26, %s2125_s25  ;;  %p69_p10 = scmp.eq.s32.totalorder %s2133_s27, 0 }
  0x24   : > { %p1899_p12 = scmp.lt.s32.totalorder %s2133_s27, 2  ;;  %p2704_p0 = scmp.eq.s32.totalorder %s2216_s28, 1 }
  0x25   : > { %s2269_s21 = scalar_select %p59_p2, %s2129_s26, %s61_s14  }
  0x26   : > { %p70_p13 = por %p69_p10, %p68_p9  ;;  %p2273_p3 = por %p2704_p0, %p68_p9 }
  0x27   : > { %s263_s23 = sand.u32 1, %s2129_s26   ;;  %s1709_s29 = sshll.u32 %s2133_s27, 8 }
  0x28   : > { %1886 = dma.hbm_to_vmem [thread:$0]  (!%p2244_p11), %s2703_s2, 256, %s234_s11, [#allocation6], %s2689_s17, %s2689_s17, %s2691_s18  }
  0x29   : > { %s2705_s22 = scalar_select %p2273_p3, 1, 0 }
  0x2a   : > { %s1599_s10 = sshll.u32 %s263_s23, 4  ;;  %s2282_s19 = scalar_lea.hbm %s2682_s1, %s1709_s29 }
  0x2b   : > { %s267_s11 = scalar_lea.vmem [#allocation2], %s1599_s10  ;;  %p2284_p11 = pnand %p1899_p12, %p70_p13 }
  0x2c   : > { %s274_s14 = sshll.u32 %s267_s11, 4  ;;  %s2290_s20 = scalar_lea.sflag [#allocation3], %s263_s23  ;;  %s2288_s14 = int_to_ptr.vmem [resolvable:$true] %s274_s14 }
  0x2d   : > { %s2007_s17 = scalar_lea.hbm %s2282_s19, 256  ;;  %p2009_p7 = pneg %p2284_p11 }
  0x2e   : > { %p2008_p5 = scmp.ne.s32.totalorder %s2282_s19, %s2007_s17  ;;  %s2012_s10 = scalar_lea.hbm %s2682_s1, 512 }
  0x2f   : > { %p2013_p10 = scmp.lt.s32.totalorder %s2282_s19, %s2682_s1  ;;  %p2014_p12 = scmp.lt.s32.totalorder %s2012_s10, %s2007_s17 }
  0x30   : > { %p2010_p2 = pnand %p2009_p7, %p2008_p5 }
  0x31   : > { %p2015_p13 = por %p2014_p12, %p2013_p10 }
  0x32   : > { %p2011_p9 = pneg %p2010_p2 }
  0x34   : > { %p2016_p0 = pnand %p2015_p13, %p2011_p9 }
  0x36   : > { %2019 = shalt.err (!%p2016_p0)
}
  0x37   : > { %s2020_s23 = scalar_lea.vmem %s2288_s14, 256  ;;  %s2138_s18 = smov [#allocation2]  }
  0x38   : > { %p2021_p1 = scmp.ne.s32.totalorder %s2288_s14, %s2020_s23  ;;  %s2025_s2 = sshll.u32 %s2138_s18, 4  ;;  %s2026_s2 = int_to_ptr.vmem [resolvable:$false] %s2025_s2 }
  0x39   : > { %s2027_s29 = scalar_lea.vmem %s2026_s2, 512  ;;  %p2028_p2 = scmp.lt.s32.totalorder %s2288_s14, %s2026_s2 }
  0x3a   : > { %p2023_p6 = pnand %p2021_p1, %p2009_p7  ;;  %p2029_p3 = scmp.lt.s32.totalorder %s2027_s29, %s2020_s23 }
  0x3c   : > { %p2024_p5 = pneg %p2023_p6  ;;  %p2030_p4 = por %p2029_p3, %p2028_p2 }
  0x3e   : > { %p2031_p8 = pnand %p2030_p4, %p2024_p5 }
  0x40   : > { %2034 = shalt.err (!%p2031_p8)
}
  0x41   : > { %s2707_s17 = smov 8   ;;  %s2708_s12 = smov 128  }
  0x42   : > { %1890 = dma.hbm_to_vmem [thread:$0]  (!%p2284_p11), %s2282_s19, 256, %s2288_s14, %s2290_s20, %s2708_s12, %s2708_s12, %s2707_s17  }
  0x43   : > { %p2709_p1 = scmp.ne.s32.totalorder %s2701_s9, 0 }
  0x44   : > { %s2317_s18 = sand.u32 (!%p2709_p1), 1, %s2125_s25   ;;  %p2710_p4 = scmp.ne.s32.totalorder (!%p2709_p1), %s2699_s30, 0 }
  0x45   : > { %286 = sbr.rel (%p2709_p1) target bundleno = 2489 (0x9b9), region = 44  ;;  %s1603_s2 = sshll.u32 (!%p2709_p1), %s2317_s18, 4 }
  0x46   : > { %s289_s10 = scalar_lea.sflag (!%p2709_p1), [#allocation3], %s2317_s18  ;;  %s292_s16 = scalar_lea.vmem (!%p2709_p1), [#allocation2], %s1603_s2 }
  0x4a   : > { %2104 = dma.done.wait (%p2710_p4), %s289_s10, 256  }
  0x4b   : > { %2106 = vsyncadd (%p2710_p4), %s289_s10, 4294967040  ;;  %p2711_p6 = scmp.eq.s32.totalorder %s2216_s28, 0 }
  0x4d   : > { %2108 = dma.done.wait (%p2711_p6), [#allocation6], 256   ;;  %p2712_p8 = pmov %p2711_p6 }
  0x4e   : > { %p335_p3 = scmp.lt.s32.totalorder %s2216_s28, 1  ;;  %vm372_vm0 = vcmask 392192   ;;  %vm346_vm1 = vcmask 261120   ;;  %v344_v0 = vld [vmem:[%s292_s16] sm:$0xff]  ;;  %v345_v1 = vld [vmem:[%s292_s16 + $0x8] sm:$0xff]  ;;  %v2139_v23 = vmov 0.0   ;;  %v361_v36 = vlaneseq }
  0x4f   : > { %2110 = vsyncadd (%p2712_p8), [#allocation6], 4294967040  ;;  %v373_v3 = vsel %vm372_vm0, %v344_v0, 0.0  ;;  %v376_v4 = vsel %vm372_vm0, %v345_v1, 0.0  ;;  %v1951_v21 = vld [vmem:[%s2686_s5 + $0x10] sm:$0xff]   ;;  %v1952_v22 = vld [vmem:[%s2685_s4 + $0x8] sm:$0xff]   ;;  %1767 = vmatprep.subr.bf16.mxu1 %v2139_v23  ;;  %1759 = vmatprep.subr.bf16.mxu0 %v2139_v23 }
  0x50   : > { %s336_s9 = scalar_select %p335_p3, %s2216_s28, 1  ;;  %374 = vadd.xlane.f32.xlu0 %v373_v3  ;;  %1768 = vmatpush3.bf16.msra.mxu1 %v1951_v21  ;;  %v1953_v24 = vld [vmem:[%s2686_s5 + $0x8] sm:$0xff]   ;;  %v1954_v25 = vld [vmem:[%s2685_s4] sm:$0xff]   ;;  %vm2140_vm2 = vmmov 0   ;;  %v2371_v37 = vshrl.u32 %v361_v36, 7  ;;  %v1958_v62 = vld [vmem:[%s2686_s5 + $0x18] sm:$0xff]  }
  0x51   : > { %1760 = vmatpush3.bf16.msra.mxu0 %v1952_v22  ;;  %1769 = vmatprep.subr.bf16.mxu1 %v2139_v23  ;;  %v1955_v26 = vld [vmem:[%s2686_s5] sm:$0xff]   ;;  %v1956_v59 = vld [vmem:[%s2686_s5 + $0x28] sm:$0xff]   ;;  %v2412_v63 = vand.u32 127, %v361_v36  ;;  %vm806_vm10 = vcmask 523264   ;;  %s2504_s16 = scalar_lea.vmem [#allocation8], %s2317_s18  ;;  %s2697_s14 = smov 64  }
  0x52   : > { %s1606_s19 = sshll.u32 %s336_s9, 3  ;;  %1761 = vmatprep.subr.bf16.mxu0 %v2139_v23  ;;  %1763 = vmatprep.mubr.msk.bf16.mxu0 %vm2140_vm2, %v2139_v23  ;;  %v2374_v38 = vsub.s32 0, %v2371_v37  ;;  %v342_v39 = vld [vmem:[%s2684_s3] sm:$0x3]  ;;  %v2382_v42 = vsub.s32 1, %v2371_v37  ;;  %s2144_s9 = smov 16  }
  0x53   : > { %s338_s20 = scalar_lea.vmem %s2681_s0, %s1606_s19  ;;  %1773 = vmatprep.mubr.msk.bf16.mxu1 %vm2140_vm2, %v2139_v23  ;;  %v2379_v41 = vld [vmem:[#allocation5] sm:$0xff]  ;;  %vm694_vm3 = vcmp.ge.s32.totalorder %v2412_v63, 8  ;;  %vm696_vm4 = vcmp.ge.s32.totalorder %v2412_v63, 16  ;;  %vm699_vm5 = vcmp.ge.s32.totalorder %v2412_v63, 24  ;;  %vm813_vm11 = vcmp.ge.s32.totalorder %v2412_v63, 32  ;;  %s2145_s19 = smov 48  }
  0x54   : > { %v2334_v2 = vld [vmem:[%s338_s20] sm:$0xff]  ;;  %377 = vadd.xlane.f32.xlu0 %v376_v4  ;;  %1770 = vmatpush3.bf16.msra.mxu1 %v1953_v24  ;;  %v403_v44 = vrot.slane %v342_v39, %v2374_v38  ;;  %v364_v46 = vrot.slane %v2379_v41, %v2374_v38  ;;  %v409_v50 = vrot.slane %v342_v39, %v2382_v42  ;;  %vm816_vm12 = vcmp.ge.s32.totalorder %v2412_v63, 48  ;;  %s2147_s15 = smov 80   ;;  %s2148_s20 = smov 112  }
  0x55   : > { %v347_v5 = vsel %vm346_vm1, %v2334_v2, 0.0  ;;  %1762 = vmatpush3.bf16.msra.mxu0 %v1954_v25  ;;  %1771 = vmatprep.subr.bf16.mxu1 %v2139_v23  ;;  %v369_v52 = vrot.slane %v2379_v41, %v2382_v42  ;;  %v1957_v61 = vld [vmem:[%s2686_s5 + $0x20] sm:$0xff]   ;;  %s2149_s30 = smov 32   ;;  %s2695_s11 = smov 96  }
  0x56   : > { %348 = vadd.xlane.f32.xlu1 %v347_v5  ;;  %1777 = vmatprep.subr.bf16.mxu0 %v2139_v23  ;;  %s1706_s23 = sshll.u32 %s2216_s28, 4  ;;  %s1475_s29 = sshll.u32 %s2504_s16, 4  ;;  %s2571_s29 = int_to_ptr.vmem [resolvable:$true] %s1475_s29 }
  0x57   : > { %s2569_s2 = scalar_lea.hbm %s2688_s7, %s1706_s23  ;;  %s1449_s10 = scalar_lea.sflag [#allocation9], %s2317_s18 }
  0x58   : > { %1772 = vmatpush3.bf16.msra.mxu1 %v1955_v26  ;;  %p2715_p7 = scmp.ne.s32.totalorder %s2705_s22, 0 }
  0x59   : > { %1787 = vmatprep.subr.bf16.mxu1 %v2139_v23 }
  0xd9   : > { %v375_v6 = vpop.xlane.xlu0 %374 }
  0xda   : > { %v380_v8 = vmul.f32 0.020833334, %v375_v6  ;;  %v485_v6 = vsub.s32 3, %v2371_v37 }
  0xdc   : > { %v382_v10 = vsub.f32 %v344_v0, %v380_v8  ;;  %v2141_v0 = vmov 0   ;;  %v486_v8 = vrot.slane %v2379_v41, %v485_v6 }
  0xdd   : > { %v378_v12 = vpop.xlane.xlu0 %377  ;;  %v2418_v3 = vsel %vm696_vm4, 1, %v2141_v0  ;;  %v700_v5 = vsel %vm699_vm5, 1, %v2141_v0 }
  0xde   : > { %v381_v13 = vmul.f32 0.020833334, %v378_v12  ;;  %v384_v14 = vmul.f32 %v382_v10, %v382_v10 }
  0xdf   : > { %v349_v7 = vpop.xlane.xlu1 %348 }
  0xe0   : > { %v351_v9 = vmul.f32 0.03125, %v349_v7  ;;  %v383_v16 = vsub.f32 %v345_v1, %v381_v13  ;;  %v386_v17 = vsel %vm372_vm0, %v384_v14, 0.0  ;;  %v695_v1 = vsel %vm694_vm3, 1, %v2141_v0 }
  0xe1   : > { %387 = vadd.xlane.f32.xlu1 %v386_v17  ;;  %v698_v4 = vadd.s32 %v2418_v3, %v695_v1 }
  0xe2   : > { %v352_v11 = vsub.f32 %v2334_v2, %v351_v9  ;;  %v385_v18 = vmul.f32 %v383_v16, %v383_v16 }
  0xe3   : > { %v701_v7 = vadd.s32 %v700_v5, %v698_v4 }
  0xe4   : > { %v353_v15 = vmul.f32 %v352_v11, %v352_v11  ;;  %v389_v20 = vsel %vm372_vm0, %v385_v18, 0.0 }
  0xe5   : > { %390 = vadd.xlane.f32.xlu0 %v389_v20  ;;  %vm1630_vm6 = vcmp.eq.s32.totalorder %v701_v7, 3  ;;  %vm1628_vm7 = vcmp.eq.s32.totalorder %v701_v7, 2  ;;  %vm1626_vm8 = vcmp.eq.s32.totalorder %v701_v7, 1  ;;  %vm1624_vm9 = vcmp.eq.s32.totalorder %v701_v7, 0 }
  0xe6   : > { %v354_v19 = vsel %vm346_vm1, %v353_v15, 0.0  ;;  %v1638_v15 = vsel %vm1630_vm6, 1.0, %v2139_v23  ;;  %v1636_v24 = vsel %vm1628_vm7, 1.0, %v2139_v23 }
  0xe7   : > { %355 = vadd.xlane.f32.xlu1 %v354_v19 }
 0x16a   : > { %v388_v27 = vpop.xlane.xlu1 %387 }
 0x16b   : > { %v392_v28 = vmul.f32 0.020833334, %v388_v27 }
 0x16d   : > { %v394_v29 = vadd.f32 1e-05, %v392_v28 }
 0x16e   : > { %v391_v30 = vpop.xlane.xlu0 %390 }
 0x16f   : > { %1965 = vrsqrt.f32 %v394_v29  ;;  %v393_v32 = vmul.f32 0.020833334, %v391_v30 }
 0x170   : > { %v356_v31 = vpop.xlane.xlu1 %355 }
 0x171   : > { %v357_v33 = vmul.f32 0.03125, %v356_v31  ;;  %v395_v34 = vadd.f32 1e-05, %v393_v32  ;;  %v1634_v32 = vsel %vm1626_vm8, 1.0, %v2139_v23 }
 0x173   : > { %v358_v35 = vadd.f32 1e-05, %v357_v33  ;;  %1967 = vrsqrt.f32 %v395_v34 }
 0x175   : > { %1969 = vrsqrt.f32 %v358_v35 }
 0x17c   : > { %v1966_v40 = vpop.eup %1965 }
 0x17d   : > { %v398_v43 = vmul.f32 %v1966_v40, %v382_v10 }
 0x17f   : > { %v404_v49 = vmul.f32 %v403_v44, %v398_v43  ;;  %v419_v43 = vsub.s32 2, %v2371_v37 }
 0x180   : > { %v1968_v45 = vpop.eup %1967 }
 0x181   : > { %v399_v48 = vmul.f32 %v1968_v45, %v383_v16  ;;  %v410_v55 = vadd.f32 %v409_v50, %v404_v49 }
 0x182   : > { %v1970_v47 = vpop.eup %1969 }
 0x183   : > { %v360_v51 = vmul.f32 %v1970_v47, %v352_v11  ;;  %v405_v53 = vmul.f32 %v403_v44, %v399_v48  ;;  %v1632_v44 = vsel %vm1624_vm9, 1.0, %v2139_v23  ;;  %v558_v47 = vsub.s32 4, %v2371_v37 }
 0x184   : > { %v420_v48 = vrot.slane %v2379_v41, %v419_v43 }
 0x185   : > { %v365_v54 = vmul.f32 %v364_v46, %v360_v51  ;;  %v411_v56 = vadd.f32 %v409_v50, %v405_v53  ;;  %v559_v51 = vrot.slane %v2379_v41, %v558_v47 }
 0x187   : > { %v370_v57 = vadd.f32 %v369_v52, %v365_v54  ;;  %v412_v58 = vpack.c.bf16 %v411_v56, %v410_v55 }
 0x189   : > { %v371_v60 = vpack.c.bf16 %v370_v57, %v370_v57  ;;  %1774 = vmatmul.mubr.msk.bf16.vlgmr.msra.gmra.mxu1 %vm372_vm0, %v412_v58 }
 0x18a   : > { %1795 = vmatprep.mubr.msk.bf16.mxu1 %vm2140_vm2, %v2139_v23 }
 0x18b   : > { %1764 = vmatmul.mubr.msk.bf16.vlgmr.msra.gmra.mxu0 %vm346_vm1, %v371_v60 }
 0x18c   : > { %1778 = vmatpush3.bf16.msra.mxu0 %v1956_v59  ;;  %1783 = vmatprep.mubr.msk.bf16.mxu0 %vm2140_vm2, %v2139_v23 }
 0x18d   : > { %1779 = vmatprep.subr.bf16.mxu0 %v2139_v23 }
 0x190   : > { %1780 = vmatpush3.bf16.msra.mxu0 %v1957_v61 }
 0x191   : > { %1781 = vmatprep.subr.bf16.mxu0 %v2139_v23 }
 0x194   : > { %1782 = vmatpush3.bf16.msra.mxu0 %v1958_v62 }
 0x195   : > { %1799 = vmatprep.subr.mxu0 %v2139_v23 }
 0x197   : > { %1784 = vmatmul.mubr.msk.bf16.vlgmr.msra.gmra.mxu0 %vm372_vm0, %v412_v58 }
 0x198   : > { %1815 = vmatprep.mubr.msk.f32.mxu0 %vm2140_vm2, %v2139_v23 }
 0x249   : > { %v542_v9 = vpop.f32.mrf.mxu1 }
 0x24a   : > { %v543_v12 = vadd.f32 %v542_v9, %v486_v8 }
 0x24b   : > { %v470_v10 = vpop.f32.mrf.mxu0  ;;  %v1775_v11 = vpop.f32.mrf.mxu1 }
 0x24c   : > { %v732_v20 = vmul.f32 %v1638_v15, %v543_v12  ;;  %v730_v28 = vmul.f32 %v1636_v24, %v543_v12  ;;  %v728_v39 = vmul.f32 %v1634_v32, %v543_v12  ;;  %v726_v49 = vmul.f32 %v1632_v44, %v543_v12 }
 0x24d   : > { %v1765_v13 = vpop.f32.mrf.mxu0  ;;  %v545_v14 = vpop.f32.mrf.mxu1  ;;  %v471_v52 = vadd.f32 %v470_v10, %v420_v48  ;;  %v1960_v48 = vld [vmem:[%s2685_s4 + $0x10] sm:$0xff]  }
 0x24e   : > { %v546_v17 = vadd.f32 %v545_v14, %v486_v8 }
 0x24f   : > { %v473_v16 = vpop.f32.mrf.mxu0  ;;  %v1776_v18 = vpop.f32.mrf.mxu1  ;;  %v476_v56 = vmul.f32 0.35355338, %v471_v52 }
 0x250   : > { %v733_v21 = vmul.f32 %v1638_v15, %v546_v17  ;;  %v731_v26 = vmul.f32 %v1636_v24, %v546_v17  ;;  %v729_v35 = vmul.f32 %v1634_v32, %v546_v17  ;;  %v727_v46 = vmul.f32 %v1632_v44, %v546_v17 }
 0x251   : > { %v1766_v19 = vpop.f32.mrf.mxu0  ;;  %v750_v59 = vpack.c.bf16 %v476_v56, %v476_v56  ;;  %v817_v17 = vsel %vm816_vm12, 1, %v2141_v0  ;;  %vm1024_vm12 = vcmask 122880   ;;  %v1115_v56 = vsub.s32 5, %v2371_v37 }
 0x252   : > { %v737_v22 = vpack.c.bf16 %v733_v21, %v732_v20  ;;  %v736_v30 = vpack.c.bf16 %v731_v26, %v730_v28  ;;  %v735_v40 = vpack.c.bf16 %v729_v35, %v728_v39  ;;  %v734_v50 = vpack.c.bf16 %v727_v46, %v726_v49  ;;  %v1959_v46 = vld [vmem:[%s2685_s4 + $0x18] sm:$0xff]  }
 0x253   : > { %v2142_v19 = vmov 1.0   ;;  %v625_v26 = vadd.s32 40, %v2371_v37  ;;  %v623_v28 = vadd.s32 24, %v2371_v37  ;;  %v621_v39 = vadd.s32 8, %v2371_v37 }
 0x254   : > { %v764_v25 = vsel %vm346_vm1, %v737_v22, 0  ;;  %v761_v34 = vsel %vm346_vm1, %v736_v30, 0  ;;  %v758_v45 = vsel %vm346_vm1, %v735_v40, 0  ;;  %v755_v54 = vsel %vm346_vm1, %v734_v50, 0 }
 0x255   : > { %1788 = vmatpush3.bf16.xpose.msra.mxu1 %v764_v25  ;;  %v627_v22 = vadd.s32 56, %v2371_v37  ;;  %v626_v25 = vadd.s32 48, %v2371_v37  ;;  %v1669_v30 = vadd.s32 4294967264, %v625_v26  ;;  %vm936_vm9 = vcmp.eq.s32.totalorder %v621_v39, %v2412_v63 }
 0x256   : > { %1789 = vmatprep.subr.bf16.mxu1 %v2139_v23 }
 0x257   : > { %v612_v27 = vpop.f32.mrf.mxu0  ;;  %vm940_vm5 = vcmp.eq.s32.totalorder %v1669_v30, %v2412_v63  ;;  %v1964_v30 = vld [vmem:[%s2685_s4 + $0x30] sm:$0xff]  }
 0x258   : > { %v613_v55 = vadd.f32 %v612_v27, %v559_v51  ;;  %v624_v27 = vadd.s32 32, %v2371_v37 }
 0x259   : > { %v1785_v29 = vpop.f32.mrf.mxu0 }
 0x25a   : > { %v744_v58 = vmul.f32 %v1638_v15, %v613_v55  ;;  %v742_v62 = vmul.f32 %v1636_v24, %v613_v55  ;;  %v740_v5 = vmul.f32 %v1634_v32, %v613_v55  ;;  %v738_v8 = vmul.f32 %v1632_v44, %v613_v55 }
 0x25b   : > { %v615_v31 = vpop.f32.mrf.mxu0  ;;  %v1670_v29 = vadd.s32 4294967248, %v626_v25 }
 0x25c   : > { %v616_v53 = vadd.f32 %v615_v31, %v559_v51  ;;  %v622_v31 = vadd.s32 16, %v2371_v37 }
 0x25d   : > { %v1786_v33 = vpop.f32.mrf.mxu0  ;;  %1790 = vmatpush3.bf16.xpose.msra.mxu1 %v761_v34  ;;  %vm941_vm4 = vcmp.eq.s32.totalorder %v1670_v29, %v2412_v63  ;;  %v1667_v34 = vadd.s32 4294967280, %v623_v28  ;;  %v1963_v29 = vld [vmem:[%s2685_s4 + $0x38] sm:$0xff]  }
 0x25e   : > { %1791 = vmatprep.subr.bf16.mxu1 %v2139_v23  ;;  %v745_v57 = vmul.f32 %v1638_v15, %v616_v53  ;;  %v743_v60 = vmul.f32 %v1636_v24, %v616_v53  ;;  %v741_v1 = vmul.f32 %v1634_v32, %v616_v53  ;;  %v739_v6 = vmul.f32 %v1632_v44, %v616_v53 }
 0x25f   : > { %v814_v15 = vsel %vm813_vm11, 1, %v2141_v0  ;;  %v1671_v24 = vadd.s32 4294967248, %v627_v22  ;;  %v2143_v32 = vmov 0.25   ;;  %v1668_v33 = vadd.s32 4294967264, %v624_v27 }
 0x260   : > { %v749_v61 = vpack.c.bf16 %v745_v57, %v744_v58  ;;  %v748_v4 = vpack.c.bf16 %v743_v60, %v742_v62  ;;  %v747_v7 = vpack.c.bf16 %v741_v1, %v740_v5  ;;  %v746_v9 = vpack.c.bf16 %v739_v6, %v738_v8 }
 0x261   : > { %v815_v16 = vadd.s32 %v814_v15, %v2418_v3  ;;  %vm942_vm3 = vcmp.eq.s32.totalorder %v1671_v24, %v2412_v63  ;;  %vm939_vm6 = vcmp.eq.s32.totalorder %v1668_v33, %v2412_v63  ;;  %v1666_v35 = vadd.s32 4294967280, %v622_v31  ;;  %v341_v31 = vld [vmem:[#allocation5 + $0x8] sm:$0x3] }
 0x262   : > { %vm938_vm7 = vcmp.eq.s32.totalorder %v1667_v34, %v2412_v63  ;;  %vm935_vm11 = vcmp.eq.s32.totalorder %v2371_v37, %v2412_v63  ;;  %v1116_v57 = vrot.slane %v2379_v41, %v1115_v56 }
 0x263   : > { %v818_v18 = vadd.s32 %v817_v17, %v815_v16  ;;  %vm937_vm8 = vcmp.eq.s32.totalorder %v1666_v35, %v2412_v63 }
 0x265   : > { %1792 = vmatpush3.bf16.xpose.msra.mxu1 %v758_v45  ;;  %vm1647_vm13 = vcmp.eq.s32.totalorder %v818_v18, 3  ;;  %vm1645_vm14 = vcmp.eq.s32.totalorder %v818_v18, 2  ;;  %vm1643_vm15 = vcmp.eq.s32.totalorder %v818_v18, 1  ;;  %vm1641_vm0 = vcmp.eq.s32.totalorder %v818_v18, 0 }
 0x266   : > { %1793 = vmatprep.subr.bf16.mxu1 %v2139_v23  ;;  %1800 = vmatpush3.msk.msra.mxu0 %vm1647_vm13, %v2142_v19 }
 0x267   : > { %1801 = vmatprep.subr.mxu0 %v2139_v23 }
 0x268   : > { %1802 = vmatpush3.msk.msra.mxu0 %vm1647_vm13, %v2142_v19  ;;  %vm1040_vm13 = vcmask 519555  }
 0x269   : > { %1803 = vmatprep.subr.mxu0 %v2139_v23 }
 0x26a   : > { %1804 = vmatpush3.msk.msra.mxu0 %vm1645_vm14, %v2142_v19 }
 0x26b   : > { %1805 = vmatprep.subr.mxu0 %v2139_v23 }
 0x26c   : > { %1806 = vmatpush3.msk.msra.mxu0 %vm1645_vm14, %v2142_v19  ;;  %vm1045_vm14 = vcmask 651780  }
 0x26d   : > { %1794 = vmatpush3.bf16.xpose.msra.mxu1 %v755_v54  ;;  %1807 = vmatprep.subr.mxu0 %v2139_v23 }
 0x26e   : > { %1837 = vmatprep.subr.bf16.mxu1 %v2139_v23  ;;  %1808 = vmatpush3.msk.msra.mxu0 %vm1643_vm15, %v2142_v19 }
 0x26f   : > { %1809 = vmatprep.subr.mxu0 %v2139_v23 }
 0x270   : > { %1810 = vmatpush3.msk.msra.mxu0 %vm1643_vm15, %v2142_v19  ;;  %vm1050_vm15 = vcmask 784005  }
 0x271   : > { %1811 = vmatprep.subr.mxu0 %v2139_v23 }
 0x272   : > { %1812 = vmatpush3.msk.msra.mxu0 %vm1641_vm0, %v2142_v19 }
 0x273   : > { %1813 = vmatprep.subr.mxu0 %v2139_v23 }
 0x274   : > { %1796 = vmatmul.mubr.msk.bf16.vlgmr.msra.gmra.mxu1 %vm346_vm1, %v750_v59  ;;  %1814 = vmatpush3.msk.msra.mxu0 %vm1641_vm0, %v2142_v19  ;;  %vm1055_vm0 = vcmask 916230  }
 0x275   : > { %1838 = vmatpush3.bf16.msra.mxu1 %v749_v61  ;;  %1845 = vmatprep.mubr.msk.bf16.mxu1 %vm2140_vm2, %v2139_v23 }
 0x276   : > { %1839 = vmatprep.subr.bf16.mxu1 %v2139_v23  ;;  %1818 = vmatprep.subr.mxu0 %v2139_v23 }
 0x279   : > { %1840 = vmatpush3.bf16.msra.mxu1 %v748_v4 }
 0x27a   : > { %1841 = vmatprep.subr.bf16.mxu1 %v2139_v23 }
 0x27d   : > { %1842 = vmatpush3.bf16.msra.mxu1 %v747_v7 }
 0x27e   : > { %1843 = vmatprep.subr.bf16.mxu1 %v2139_v23 }
 0x281   : > { %1844 = vmatpush3.bf16.msra.mxu1 %v746_v9 }
 0x282   : > { %1865 = vmatprep.subr.bf16.mxu1 %v2139_v23 }
 0x334   : > { %v800_v10 = vpop.f32.mrf.mxu1 }
 0x335   : > { %v807_v11 = vsel %vm806_vm10, %v800_v10, -inf }
 0x336   : > { %808 = vmax.xlane.f32.xlu0 %v807_v11  ;;  %v1797_v12 = vpop.f32.mrf.mxu1  ;;  %v1962_v11 = vld [vmem:[%s2685_s4 + $0x20] sm:$0xff]  }
 0x338   : > { %v803_v13 = vpop.f32.mrf.mxu1 }
 0x33a   : > { %v1798_v14 = vpop.f32.mrf.mxu1 }
 0x3bf   : > { %v809_v0 = vpop.xlane.xlu0 %808 }
 0x3c0   : > { %v810_v3 = vsub.f32 %v800_v10, %v809_v0  ;;  %v1961_v10 = vld [vmem:[%s2685_s4 + $0x28] sm:$0xff]  }
 0x3c2   : > { %v811_v20 = vmul.f32 1.442695, %v810_v3  ;;  %v1188_v3 = vsub.s32 6, %v2371_v37 }
 0x3c4   : > { %1971 = vpow2.f32 %v811_v20  ;;  %v1193_v20 = vsub.s32 7, %v2371_v37 }
 0x3c6   : > { %v1194_v25 = vrot.slane %v2379_v41, %v1193_v20 }
 0x3d1   : > { %v1972_v21 = vpop.eup %1971 }
 0x3d2   : > { %1816 = vmatmul.mubr.msk.f32.vlgmr.msra.gmra.mxu0 %vm806_vm10, %v1972_v21 }
 0x3d3   : > { %1834 = vmatprep.mubr.msk.f32.mxu0 %vm2140_vm2, %v2139_v23  ;;  %1819 = vmatpush3.msk.msra.mxu0 %vm942_vm3, %v2143_v32  ;;  %vm1060_vm3 = vcmask 1048455  }
 0x3d4   : > { %1820 = vmatprep.subr.mxu0 %v2139_v23 }
 0x3d5   : > { %1821 = vmatpush3.msk.msra.mxu0 %vm941_vm4, %v2143_v32 }
 0x3d6   : > { %1822 = vmatprep.subr.mxu0 %v2139_v23 }
 0x3d7   : > { %1823 = vmatpush3.msk.msra.mxu0 %vm940_vm5, %v2143_v32  ;;  %vm2554_vm5 = vcmp.lt.s32.totalorder %v361_v36, 32 }
 0x3d8   : > { %1824 = vmatprep.subr.mxu0 %v2139_v23 }
 0x3d9   : > { %1825 = vmatpush3.msk.msra.mxu0 %vm939_vm6, %v2143_v32 }
 0x3da   : > { %1826 = vmatprep.subr.mxu0 %v2139_v23 }
 0x3db   : > { %1827 = vmatpush3.msk.msra.mxu0 %vm938_vm7, %v2143_v32 }
 0x3dc   : > { %1828 = vmatprep.subr.mxu0 %v2139_v23 }
 0x3dd   : > { %1829 = vmatpush3.msk.msra.mxu0 %vm937_vm8, %v2143_v32 }
 0x3de   : > { %1830 = vmatprep.subr.mxu0 %v2139_v23 }
 0x3df   : > { %1831 = vmatpush3.msk.msra.mxu0 %vm936_vm9, %v2143_v32 }
 0x3e0   : > { %1832 = vmatprep.subr.mxu0 %v2139_v23 }
 0x3e1   : > { %1833 = vmatpush3.msk.msra.mxu0 %vm935_vm11, %v2143_v32 }
 0x3e2   : > { %1849 = vmatprep.subr.bf16.mxu0 %v2139_v23 }
 0x492   : > { %v912_v40 = vpop.f32.mrf.mxu0 }
 0x493   : > { %v916_v43 = vmax.f32 %v912_v40, 1e-30 }
 0x494   : > { %v1817_v44 = vpop.f32.mrf.mxu0 }
 0x495   : > { %1973 = vrcp.f32 %v916_v43 }
 0x4a2   : > { %v1974_v45 = vpop.eup %1973 }
 0x4a3   : > { %v918_v47 = vmul.f32 %v1974_v45, %v1972_v21  ;;  %v1189_v21 = vrot.slane %v2379_v41, %v1188_v3  ;;  %v1205_v41 = vrot.slane %v341_v31, %v2374_v38 }
 0x4a5   : > { %1835 = vmatmul.mubr.msk.f32.vlgmr.msra.gmra.mxu0 %vm806_vm10, %v918_v47  ;;  %v1062_v63 = vpack.c.bf16 %v918_v47, %v918_v47 }
 0x4a6   : > { %1850 = vmatpush3.bf16.msra.mxu0 %v1959_v46  ;;  %1853 = vmatprep.mubr.msk.bf16.mxu0 %vm2140_vm2, %v2139_v23 }
 0x4a7   : > { %1846 = vmatmul.mubr.msk.bf16.vlgmr.msra.gmra.mxu1 %vm806_vm10, %v1062_v63  ;;  %1851 = vmatprep.subr.bf16.mxu0 %v2139_v23  ;;  %vm1035_vm10 = vcmask 387330  }
 0x4a8   : > { %1869 = vmatprep.mubr.msk.bf16.mxu1 %vm2140_vm2, %v2139_v23  ;;  %1866 = vmatpush3.bf16.msra.mxu1 %v1963_v29 }
 0x4a9   : > { %1867 = vmatprep.subr.bf16.mxu1 %v2139_v23 }
 0x4aa   : > { %1852 = vmatpush3.bf16.msra.mxu0 %v1960_v48 }
 0x4ab   : > { %1857 = vmatprep.subr.bf16.mxu0 %v2139_v23 }
 0x4ac   : > { %1868 = vmatpush3.bf16.msra.mxu1 %v1964_v30 }
 0x565   : > { %v1020_v49 = vpop.f32.mrf.mxu0 }
 0x566   : > { %1025 = vst.msk [vmem:[%s2504_s16] sm:$0x1] %vm1024_vm12, %v1020_v49 }
 0x567   : > { %v1836_v50 = vpop.f32.mrf.mxu0  ;;  %v1100_v51 = vpop.f32.mrf.mxu1 }
 0x568   : > { %v1106_v52 = vpack.c.bf16 %v1100_v51, %v1100_v51 }
 0x569   : > { %v1847_v53 = vpop.f32.mrf.mxu1 }
 0x56a   : > { %1854 = vmatmul.mubr.msk.bf16.vlgmr.msra.gmra.mxu0 %vm346_vm1, %v1106_v52 }
 0x56b   : > { %v1103_v54 = vpop.f32.mrf.mxu1  ;;  %1861 = vmatprep.mubr.msk.bf16.mxu0 %vm2140_vm2, %v2139_v23  ;;  %vm1030_vm2 = vcmask 255105   ;;  %1858 = vmatpush3.bf16.msra.mxu0 %v1961_v10 }
 0x56c   : > { %1859 = vmatprep.subr.bf16.mxu0 %v2139_v23 }
 0x56d   : > { %v1848_v55 = vpop.f32.mrf.mxu1 }
 0x56f   : > { %1860 = vmatpush3.bf16.msra.mxu0 %v1962_v11 }
 0x62a   : > { %v1166_v58 = vpop.f32.mrf.mxu0 }
 0x62b   : > { %v1167_v59 = vadd.f32 %v1166_v58, %v1116_v57 }
 0x62c   : > { %v1855_v60 = vpop.f32.mrf.mxu0 }
 0x62d   : > { %v2513_v61 = vadd.f32 %v1167_v59, %v2334_v2  ;;  %v2151_v59 = vmov -1.0  }
 0x62e   : > { %v1169_v62 = vpop.f32.mrf.mxu0 }
 0x62f   : > { %v1173_v1 = vsel %vm346_vm1, %v2513_v61, 0.0 }
 0x630   : > { %1174 = vadd.xlane.f32.xlu1 %v1173_v1  ;;  %v1856_v4 = vpop.f32.mrf.mxu0 }
 0x641   : > { %1027 = vrot.lane.b32.xlu1 %v1020_v49, %s2144_s9  ;;  %s2035_s9 = scalar_lea.vmem %s2571_s29, 16 }
 0x642   : > { %p2036_p11 = scmp.ne.s32.totalorder %s2571_s29, %s2035_s9 }
 0x644   : > { %p2037_p9 = pnand %p2036_p11, %p2715_p7 }
 0x645   : > { %1037 = vrot.lane.b32.xlu1 %v1020_v49, %s2145_s19 }
 0x646   : > { %p2038_p10 = pneg %p2037_p9 }
 0x649   : > { %1042 = vrot.lane.b32.xlu1 %v1020_v49, %s2697_s14 }
 0x64d   : > { %1047 = vrot.lane.b32.xlu1 %v1020_v49, %s2147_s15  ;;  %s1605_s15 = sshll.u32 %s2317_s18, 1 }
 0x651   : > { %1057 = vrot.lane.b32.xlu1 %v1020_v49, %s2148_s20  ;;  %s2559_s20 = scalar_lea.vmem [#allocation7], %s1605_s15 }
 0x6b9   : > { %v1175_v2 = vpop.xlane.xlu1 %1174 }
 0x6ba   : > { %v1176_v5 = vmul.f32 0.03125, %v1175_v2 }
 0x6bc   : > { %v1177_v6 = vsub.f32 %v2513_v61, %v1176_v5 }
 0x6bd   : > { %v1028_v7 = vpop.permute.xlu1 %1027 }
 0x6be   : > { %1031 = vst.msk [vmem:[%s2504_s16 - $0x1] sm:$0x2] %vm1030_vm2, %v1028_v7  ;;  %v1178_v8 = vmul.f32 %v1177_v6, %v1177_v6 }
 0x6c0   : > { %v1179_v9 = vsel %vm346_vm1, %v1178_v8, 0.0  ;;  %v1296_v8 = vrot.slane %v341_v31, %v2382_v42 }
 0x6c1   : > { %1180 = vadd.xlane.f32.xlu0 %v1179_v9  ;;  %v1038_v12 = vpop.permute.xlu1 %1037 }
 0x6c5   : > { %v1043_v13 = vpop.permute.xlu1 %1042 }
 0x6c9   : > { %v1048_v16 = vpop.permute.xlu1 %1047 }
 0x6cd   : > { %v1058_v0 = vpop.permute.xlu1 %1057 }
 0x6d7   : > { %1032 = vrot.lane.b32.xlu0 %v1020_v49, %s2149_s30 }
 0x6db   : > { %1052 = vrot.lane.b32.xlu0 %v1020_v49, %s2695_s11 }
 0x74a   : > { %v1181_v14 = vpop.xlane.xlu0 %1180 }
 0x74b   : > { %v1182_v15 = vmul.f32 0.03125, %v1181_v14 }
 0x74d   : > { %v1183_v17 = vadd.f32 1e-05, %v1182_v15 }
 0x74e   : > { %v1033_v18 = vpop.permute.xlu0 %1032 }
 0x74f   : > { %1975 = vrsqrt.f32 %v1183_v17  ;;  %1036 = vst.msk [vmem:[%s2504_s16 - $0x2] sm:$0x4] %vm1035_vm10, %v1033_v18 }
 0x750   : > { %1041 = vst.msk [vmem:[%s2504_s16 - $0x3] sm:$0x8] %vm1040_vm13, %v1038_v12 }
 0x751   : > { %1046 = vst.msk [vmem:[%s2504_s16 - $0x4] sm:$0x10] %vm1045_vm14, %v1043_v13 }
 0x752   : > { %v1053_v19 = vpop.permute.xlu0 %1052  ;;  %1051 = vst.msk [vmem:[%s2504_s16 - $0x5] sm:$0x20] %vm1050_vm15, %v1048_v16 }
 0x753   : > { %1056 = vst.msk [vmem:[%s2504_s16 - $0x6] sm:$0x40] %vm1055_vm0, %v1053_v19 }
 0x754   : > { %1061 = vst.msk [vmem:[%s2504_s16 - $0x7] sm:$0x80] %vm1060_vm3, %v1058_v0  ;;  %s2153_s16 = smov [#allocation8]  }
 0x755   : > { %s2039_s19 = sshll.u32 %s2153_s16, 4  ;;  %s2040_s19 = int_to_ptr.vmem [resolvable:$false] %s2039_s19 }
 0x756   : > { %s2041_s15 = scalar_lea.vmem %s2040_s19, 32  ;;  %p2042_p12 = scmp.lt.s32.totalorder %s2571_s29, %s2040_s19 }
 0x757   : > { %p2043_p13 = scmp.lt.s32.totalorder %s2041_s15, %s2035_s9 }
 0x759   : > { %p2044_p0 = por %p2043_p13, %p2042_p12 }
 0x75b   : > { %p2045_p5 = pnand %p2044_p0, %p2038_p10 }
 0x75c   : > { %v1976_v22 = vpop.eup %1975 }
 0x75d   : > { %v1185_v24 = vmul.f32 %v1976_v22, %v1177_v6  ;;  %v2152_v6 = vmov 1966171168  }
 0x75e   : > { %v1360_v7 = vunpack.c.l.s4 %v2152_v6 }
 0x75f   : > { %v1190_v26 = vmul.f32 %v1189_v21, %v1185_v24 }
 0x760   : > { %v1361_v9 = vunpack.c.0.s8 %v1360_v7 }
 0x761   : > { %v1195_v27 = vadd.f32 %v1194_v25, %v1190_v26 }
 0x762   : > { %v1364_v12 = vsub.s32 %v1361_v9, %v2371_v37 }
 0x763   : > { %v1196_v28 = vpack.c.bf16 %v1195_v27, %v1195_v27 }
 0x765   : > { %1862 = vmatmul.mubr.msk.bf16.vlgmr.msra.gmra.mxu0 %vm346_vm1, %v1196_v28 }
 0x825   : > { %v1255_v32 = vpop.f32.mrf.mxu0 }
 0x826   : > { %v1256_v33 = vadd.f32 %v1255_v32, %v1205_v41 }
 0x827   : > { %v1863_v34 = vpop.f32.mrf.mxu0 }
 0x828   : > { %v1262_v35 = vmul.f32 0.70710677, %v1256_v33  ;;  %v1261_v1 = vmul.f32 0.5, %v1256_v33 }
 0x829   : > { %v1258_v39 = vpop.f32.mrf.mxu0 }
 0x82a   : > { %v1265_v40 = vand.u32 2147483647, %v1262_v35  ;;  %vm1263_vm4 = vcmp.ge.f32.partialorder %v1262_v35, 0.0 }
 0x82b   : > { %v1864_v43 = vpop.f32.mrf.mxu0  ;;  %v1264_v60 = vsel %vm1263_vm4, 1.0, %v2151_v59 }
 0x82c   : > { %v1266_v44 = vmul.f32 0.3275911, %v1265_v40  ;;  %v1278_v46 = vsub.f32 0.0, %v1265_v40 }
 0x82e   : > { %v1267_v45 = vadd.f32 1.0, %v1266_v44  ;;  %v1279_v23 = vmul.f32 %v1278_v46, %v1265_v40 }
 0x830   : > { %1977 = vrcp.f32 %v1267_v45  ;;  %v1280_v48 = vmul.f32 1.442695, %v1279_v23 }
 0x832   : > { %1979 = vpow2.f32 %v1280_v48 }
 0x83d   : > { %v1978_v47 = vpop.eup %1977 }
 0x83e   : > { %v1269_v63 = vmul.f32 1.0614054, %v1978_v47 }
 0x83f   : > { %v1980_v56 = vpop.eup %1979 }
 0x840   : > { %v1270_v49 = vadd.f32 -1.4531521, %v1269_v63 }
 0x842   : > { %v1271_v50 = vmul.f32 %v1978_v47, %v1270_v49 }
 0x844   : > { %v1272_v51 = vadd.f32 1.4214138, %v1271_v50 }
 0x846   : > { %v1273_v38 = vmul.f32 %v1978_v47, %v1272_v51 }
 0x848   : > { %v1274_v52 = vadd.f32 -0.28449672, %v1273_v38 }
 0x84a   : > { %v1275_v53 = vmul.f32 %v1978_v47, %v1274_v52 }
 0x84c   : > { %v1276_v54 = vadd.f32 0.2548296, %v1275_v53 }
 0x84e   : > { %v1277_v55 = vmul.f32 %v1978_v47, %v1276_v54 }
 0x850   : > { %v1282_v57 = vmul.f32 %v1980_v56, %v1277_v55 }
 0x852   : > { %v1283_v58 = vsub.f32 1.0, %v1282_v57 }
 0x854   : > { %v1284_v62 = vmul.f32 %v1283_v58, %v1264_v60 }
 0x856   : > { %v1285_v4 = vadd.f32 1.0, %v1284_v62 }
 0x858   : > { %v1286_v2 = vmul.f32 %v1285_v4, %v1261_v1 }
 0x85a   : > { %v1287_v5 = vpack.c.bf16 %v1286_v2, %v1286_v2 }
 0x85c   : > { %1870 = vmatmul.mubr.msk.bf16.vlgmr.msra.gmra.mxu1 %vm346_vm1, %v1287_v5 }
 0x91c   : > { %v1346_v10 = vpop.f32.mrf.mxu1 }
 0x91d   : > { %v1347_v11 = vadd.f32 %v1346_v10, %v1296_v8 }
 0x91e   : > { %v1871_v14 = vpop.f32.mrf.mxu1 }
 0x91f   : > { %v1352_v15 = vadd.f32 %v1347_v11, %v2513_v61 }
 0x920   : > { %v1349_v16 = vpop.f32.mrf.mxu1 }
 0x921   : > { %1357 = vst.msk [vmem:[%s2559_s20] sm:$0x1] %vm2554_vm5, %v1352_v15  ;;  %v1404_v42 = vcombine.high %v1352_v15, %v1352_v15  ;;  %v1365_v37 = vrot.slane %v1352_v15, %v1364_v12 }
 0x922   : > { %v1872_v17 = vpop.f32.mrf.mxu1 }
 0x923   : > { %v1373_v18 = vrot.slane %v1365_v37, %v1364_v12  ;;  %v1366_v19 = vcombine.high %v1365_v37, %v1365_v37  ;;  %v1411_v0 = vrot.slane %v1404_v42, %v1364_v12 }
 0x925   : > { %v1388_v3 = vcombine.high %v1373_v18, %v1373_v18  ;;  %v1380_v20 = vrot.slane %v1366_v19, %v1364_v12  ;;  %v1421_v21 = vcombine.high %v1411_v0, %v1411_v0  ;;  %v1418_v61 = vrot.slane %v1411_v0, %v1364_v12 }
 0x927   : > { %1389 = vrot.lane.b32.xlu1 %v1388_v3, %s2697_s14  ;;  %1381 = vrot.lane.b32.xlu0 %v1380_v20, %s2149_s30  ;;  %1420 = vst.msk [vmem:[%s2559_s20 + $0x1] sm:$0x1] %vm2554_vm5, %v1418_v61 }
 0x928   : > { %2048 = shalt.err (!%p2045_p5)
}
 0x929   : > { %s2049_s23 = scalar_lea.hbm %s2569_s2, 16  ;;  %s2053_s16 = scalar_lea.hbm %s2688_s7, 32 }
 0x92a   : > { %p2050_p2 = scmp.ne.s32.totalorder %s2569_s2, %s2049_s23  ;;  %p2054_p6 = scmp.lt.s32.totalorder %s2569_s2, %s2688_s7 }
 0x92b   : > { %p2055_p8 = scmp.lt.s32.totalorder %s2053_s16, %s2049_s23 }
 0x92c   : > { %p2051_p1 = pnand %p2050_p2, %p2715_p7 }
 0x92d   : > { %p2056_p3 = por %p2055_p8, %p2054_p6 }
 0x92e   : > { %p2052_p4 = pneg %p2051_p1 }
 0x930   : > { %p2057_p11 = pnand %p2056_p3, %p2052_p4 }
 0x932   : > { %2060 = shalt.err (!%p2057_p11)
}
 0x933   : > { %1880 = dma.vmem_to_hbm [thread:$0]  (%p2715_p7), %s2571_s29, 16, %s2569_s2, %s1449_s10   ;;  %v1428_v22 = vrot.slane %v1421_v21, %v1364_v12  ;;  %v1433_v24 = vcombine.high %v1418_v61, %v1418_v61  ;;  %v1396_v26 = vcombine.high %v1380_v20, %v1380_v20  ;;  %vm2604_vm1 = vcmp.ge.s32.totalorder %v361_v36, 32 }
 0x934   : > { %s2716_s9 = smov 64   ;;  %s2717_s14 = smov 96   ;;  %vm2609_vm6 = vcmp.lt.s32.totalorder %v361_v36, 64  ;;  %vm2614_vm7 = vcmp.ge.s32.totalorder %v361_v36, 64  ;;  %vm1393_vm8 = vcmp.lt.s32.totalorder %v361_v36, 96  ;;  %vm1400_vm12 = vcmp.ge.s32.totalorder %v361_v36, 96 }
 0x935   : > { %1429 = vrot.lane.b32.xlu1 %v1428_v22, %s2149_s30  ;;  %1434 = vrot.lane.b32.xlu0 %v1433_v24, %s2716_s9  ;;  %v1438_v25 = vcombine.high %v1428_v22, %v1428_v22  ;;  %vm1386_vm9 = vmand %vm2604_vm1, %vm2609_vm6  ;;  %vm1401_vm2 = vcmp.lt.s32.totalorder %v361_v36, 128  ;;  %s1710_s30 = sshll.u32 %s2216_s28, 5  ;;  %s1462_s11 = sshll.u32 %s2559_s20, 4  ;;  %s2638_s11 = int_to_ptr.vmem [resolvable:$true] %s1462_s11 }
 0x936   : > { %vm1394_vm11 = vmand %vm2614_vm7, %vm1393_vm8  ;;  %s2636_s10 = scalar_lea.hbm %s2687_s6, %s1710_s30  ;;  %s1444_s19 = scalar_lea.sflag [#allocation4], %s2317_s18 }
 0x937   : > { %vm1402_vm10 = vmand %vm1400_vm12, %vm1401_vm2  ;;  %s2061_s28 = scalar_lea.vmem %s2638_s11, 32  ;;  %s2154_s15 = smov [#allocation7]  }
 0x938   : > { %p2062_p9 = scmp.ne.s32.totalorder %s2638_s11, %s2061_s28  ;;  %s2065_s23 = sshll.u32 %s2154_s15, 4  ;;  %s2066_s23 = int_to_ptr.vmem [resolvable:$false] %s2065_s23 }
 0x939   : > { %1439 = vrot.lane.b32.xlu1 %v1438_v25, %s2717_s14  ;;  %1397 = vrot.lane.b32.xlu0 %v1396_v26, %s2717_s14  ;;  %s2067_s17 = scalar_lea.vmem %s2066_s23, 64  ;;  %p2068_p13 = scmp.lt.s32.totalorder %s2638_s11, %s2066_s23 }
 0x93a   : > { %p2063_p10 = pnand %p2062_p9, %p2715_p7  ;;  %p2069_p0 = scmp.lt.s32.totalorder %s2067_s17, %s2061_s28 }
 0x93c   : > { %p2064_p12 = pneg %p2063_p10  ;;  %p2070_p5 = por %p2069_p0, %p2068_p13 }
 0x93e   : > { %p2071_p2 = pnand %p2070_p5, %p2064_p12 }
 0x999   : > { %v1390_v30 = vpop.permute.xlu1 %1389  ;;  %v1382_v31 = vpop.permute.xlu0 %1381 }
 0x99a   : > { %1387 = vst.msk [vmem:[%s2559_s20] sm:$0x1] %vm1386_vm9, %v1382_v31 }
 0x99b   : > { %1395 = vst.msk [vmem:[%s2559_s20] sm:$0x1] %vm1394_vm11, %v1390_v30 }
 0x9a7   : > { %v1430_v41 = vpop.permute.xlu1 %1429  ;;  %v1435_v32 = vpop.permute.xlu0 %1434 }
 0x9a8   : > { %1432 = vst.msk [vmem:[%s2559_s20 + $0x1] sm:$0x1] %vm1386_vm9, %v1430_v41 }
 0x9a9   : > { %1437 = vst.msk [vmem:[%s2559_s20 + $0x1] sm:$0x1] %vm1394_vm11, %v1435_v32 }
 0x9ab   : > { %v1440_v33 = vpop.permute.xlu1 %1439  ;;  %v1398_v36 = vpop.permute.xlu0 %1397 }
 0x9ac   : > { %1442 = vst.msk [vmem:[%s2559_s20 + $0x1] sm:$0x1] %vm1402_vm10, %v1440_v33  ;;  %1403 = vst.msk [vmem:[%s2559_s20] sm:$0x1] %vm1402_vm10, %v1398_v36 }
 0x9ad   : > { %2074 = shalt.err (!%p2071_p2)
}
 0x9ae   : > { %s2075_s20 = scalar_lea.hbm %s2636_s10, 32  ;;  %s2079_s16 = scalar_lea.hbm %s2687_s6, 64 }
 0x9af   : > { %p2076_p1 = scmp.ne.s32.totalorder %s2636_s10, %s2075_s20  ;;  %p2080_p8 = scmp.lt.s32.totalorder %s2636_s10, %s2687_s6 }
 0x9b0   : > { %p2081_p3 = scmp.lt.s32.totalorder %s2079_s16, %s2075_s20 }
 0x9b1   : > { %p2077_p4 = pnand %p2076_p1, %p2715_p7 }
 0x9b2   : > { %p2082_p11 = por %p2081_p3, %p2080_p8 }
 0x9b3   : > { %p2078_p6 = pneg %p2077_p4 }
 0x9b5   : > { %p2083_p9 = pnand %p2082_p11, %p2078_p6 }
 0x9b7   : > { %2086 = shalt.err (!%p2083_p9)
}
 0x9b8   : > { %1879 = dma.vmem_to_hbm [thread:$0]  (%p2715_p7), %s2638_s11, 32, %s2636_s10, %s1444_s19  }
 0x9b9 PF: > { %s1487_s30 = sand.u32 1, %s2121_s24   ;;  %p2724_p10 = scmp.ne.s32.totalorder %s2700_s8, 0 }
 0x9ba   : > { %p2725_p12 = scmp.ge.s32.totalorder %s2133_s27, 2  ;;  %s1488_s29 = scalar_lea.sflag [#allocation4], %s1487_s30 }
 0x9bc   : > { %p1892_p13 = pnand %p2725_p12, %p2724_p10 }
 0x9be   : > { %p1893_p0 = pneg %p1892_p13 }
 0x9c0   : > { %2112 = dma.done.wait (%p1893_p0), %s1488_s29, 32  }
 0x9c1   : > { %2114 = vsyncadd (%p1893_p0), %s1488_s29, 4294967264  ;;  %s1497_s2 = scalar_lea.sflag [#allocation9], %s1487_s30 }
 0x9c2   : > { %2116 = dma.done.wait (%p1893_p0), %s1497_s2, 16  }
 0x9c3   : > { %2118 = vsyncadd (%p1893_p0), %s1497_s2, 4294967280  ;;  %p25_p7 = scmp.ge.s32.totalorder %s2249_s13, 4   ;;  %s2726_s24 = smov %s2125_s25 }
 0x9c4   : > { %s2727_s25 = smov %s2129_s26  ;;  %s2728_s26 = smov %s2269_s21 }
 0x9c5   : > { %s2729_s27 = smov %s2249_s13  ;;  %27 = sbr.rel (!%p25_p7) target bundleno = 10 (0xa), region = 117 }
 0x9ca   :  { %1501 = vsyncpa [#allocation3], 1 }
 0x9cb   :  { %1503 = vsyncpa [#allocation3 + $0x1], 1 }
 0x9cc   :  { %1504 = vsyncpa [#allocation6], 1 }
 0x9cd   :  { %1505 = vsyncpa [#allocation4], 1 }
 0x9ce   :  { %1507 = vsyncpa [#allocation4 + $0x1], 1 }
 0x9cf   :  { %1508 = vsyncpa [#allocation9], 1 }
 0x9d0   :  { %1510 = vsyncpa [#allocation9 + $0x1], 1 }

</bundles_post_ra>
